<compile_context>
chip_gen: v5e
topology: v5e:2x2
jax: 0.10.0
libtpu: 0.0.40
codegen_flags: <defaults>
</compile_context>

<pallas_src>
import functools

import jax
import jax.numpy as jnp
import numpy as np
from jax.experimental import pallas as pl
from jax.experimental.pallas import tpu as pltpu

BN_EPS = 1e-5


def _vmem_limit_bytes():
    """Generation-aware scoped-VMEM budget with a safe fallback."""
    try:
        cap = pltpu.get_tpu_info().vmem_capacity_bytes
        # Leave headroom below physical capacity; cap at 100 MiB.
        return int(max(min(cap - (16 << 20), 100 << 20), 32 << 20))
    except Exception:
        return 32 << 20


# -----------------------------------------------------------------------------
# Pass 1: implicit-GEMM conv (recomputed, never written) -> per-image stats
# -----------------------------------------------------------------------------
def _conv_stats_kernel(x_ref, w_ref, mask_ref, stats_ref, acc_ref, *,
                       wp, k_h, k_w):
    m_rows = acc_ref.shape[0]
    x = x_ref[0]                                 # (r_in, Cin) bf16

    first = True
    for dh in range(k_h):
        for dw in range(k_w):
            off = dh * wp + dw
            t = jnp.dot(x[off:off + m_rows, :], w_ref[dh, dw],
                        preferred_element_type=jnp.float32)
            if first:
                acc_ref[...] = t
                first = False
            else:
                acc_ref[...] += t

    # Exclude wrap columns (over-computed garbage) from the BN statistics.
    accv = acc_ref[...] * mask_ref[...]          # (m_rows, Cp) * (m_rows, 1)
    stats_ref[0, 0:1, :] = jnp.sum(accv, axis=0, keepdims=True)
    stats_ref[0, 1:2, :] = jnp.sum(accv * accv, axis=0, keepdims=True)


# -----------------------------------------------------------------------------
# Pass 2: recompute conv, apply folded BN scale/shift (+ ReLU), crop in-kernel
# -----------------------------------------------------------------------------
def _conv_bn_act_kernel(x_ref, w_ref, scale_ref, shift_ref, out_ref, acc_ref, *,
                        wp, w_out, k_h, k_w, use_activation):
    m_rows = acc_ref.shape[0]
    h_out = out_ref.shape[1]
    cout = out_ref.shape[3]
    x = x_ref[0]                                 # (r_in, Cin) bf16

    first = True
    for dh in range(k_h):
        for dw in range(k_w):
            off = dh * wp + dw
            t = jnp.dot(x[off:off + m_rows, :], w_ref[dh, dw],
                        preferred_element_type=jnp.float32)
            if first:
                acc_ref[...] = t
                first = False
            else:
                acc_ref[...] += t

    scale = scale_ref[...]                       # (1, Cout) f32
    shift = shift_ref[...]                       # (1, Cout) f32

    # BN affine + ReLU only on valid elements; crop wrap columns and padded
    # channels before anything is written to HBM.
    for h in range(h_out):
        blk = acc_ref[h * wp:h * wp + w_out, :]  # (w_out, Cp)
        y = blk[:, :cout] * scale + shift        # (w_out, Cout)
        if use_activation:
            y = jnp.maximum(y, 0.0)
        out_ref[0, h] = y.astype(out_ref.dtype)


# -----------------------------------------------------------------------------
# Wrapper: layout plumbing + two pallas_calls
# -----------------------------------------------------------------------------
def conv_block_forward(x_nchw, conv_w, conv_b, bn_gamma, bn_beta,
                       kernel_size, padding_size, use_activation=False):
    """Pallas equivalent of ConvBlock.forward (stride 1, training-mode BN)."""
    del conv_b  # training-mode BN mean subtraction cancels the conv bias.

    n, cin, h, w = x_nchw.shape
    cout, cin_w, k_h, k_w = conv_w.shape
    assert cin_w == cin and k_h == kernel_size and k_w == kernel_size
    pad = padding_size

    hp, wp = h + 2 * pad, w + 2 * pad
    h_out, w_out = hp - k_h + 1, wp - k_w + 1
    m_rows = h_out * wp                          # per-image rows incl. wrap cols
    m_valid = n * h_out * w_out                  # BN reduction count over (N,H,W)
    cp = ((cout + 127) // 128) * 128             # lane-dense GEMM channel count

    # NCHW -> NHWC, spatial zero-pad, flatten (Hp,Wp) -> rows, tail rows so the
    # last tap's slice stays in-bounds, cast to bf16 (MXU operands).
    x_nhwc = jnp.transpose(x_nchw, (0, 2, 3, 1))
    x_pad = jnp.pad(x_nhwc, ((0, 0), (pad, pad), (pad, pad), (0, 0)))
    r_in = ((hp * wp + (k_w - 1) + 7) // 8) * 8
    x_flat = jnp.pad(x_pad.reshape(n, hp * wp, cin),
                     ((0, 0), (0, r_in - hp * wp), (0, 0))).astype(jnp.bfloat16)

    # (Cout, Cin, KH, KW) -> (KH, KW, Cin, Cp), zero-padded channels, bf16.
    w_t = jnp.transpose(conv_w, (2, 3, 1, 0))
    w_t = jnp.pad(w_t, ((0, 0), (0, 0), (0, 0), (0, cp - cout))).astype(jnp.bfloat16)

    # Valid-column mask (hoisted out of the per-step kernel body).
    col = jnp.arange(m_rows, dtype=jnp.int32) % wp
    mask = (col < w_out).astype(jnp.float32).reshape(m_rows, 1)

    vmem_limit = _vmem_limit_bytes()

    # ---- pass 1: per-image conv recompute -> per-channel sum / sumsq ----
    stats_part = pl.pallas_call(
        functools.partial(_conv_stats_kernel, wp=wp, k_h=k_h, k_w=k_w),
        grid=(n,),
        in_specs=[
            pl.BlockSpec((1, r_in, cin), lambda i: (i, 0, 0)),
            pl.BlockSpec((k_h, k_w, cin, cp), lambda i: (0, 0, 0, 0)),
            pl.BlockSpec((m_rows, 1), lambda i: (0, 0)),
        ],
        out_specs=pl.BlockSpec((1, 2, cp), lambda i: (i, 0, 0)),
        out_shape=jax.ShapeDtypeStruct((n, 2, cp), jnp.float32),
        scratch_shapes=[pltpu.VMEM((m_rows, cp), jnp.float32)],
        compiler_params=pltpu.CompilerParams(
            dimension_semantics=("parallel",),
            vmem_limit_bytes=vmem_limit),
    )(x_flat, w_t, mask)

    # Tiny (N,2,Cout) partial-stat reduce + BN scale/shift fold in XLA.
    stats = jnp.sum(stats_part, axis=0)[:, :cout]        # (2, Cout)
    inv_m = 1.0 / float(m_valid)
    mean = stats[0] * inv_m
    var = jnp.maximum(stats[1] * inv_m - mean * mean, 0.0)
    inv_std = jax.lax.rsqrt(var + BN_EPS)
    scale_1d = bn_gamma.astype(jnp.float32) * inv_std
    shift_1d = bn_beta.astype(jnp.float32) - mean * scale_1d
    scale = scale_1d.reshape(1, cout)
    shift = shift_1d.reshape(1, cout)

    # ---- pass 2: recompute conv, folded BN (+ ReLU), in-kernel crop ----
    y = pl.pallas_call(
        functools.partial(_conv_bn_act_kernel, wp=wp, w_out=w_out,
                          k_h=k_h, k_w=k_w,
                          use_activation=bool(use_activation)),
        grid=(n,),
        in_specs=[
            pl.BlockSpec((1, r_in, cin), lambda i: (i, 0, 0)),
            pl.BlockSpec((k_h, k_w, cin, cp), lambda i: (0, 0, 0, 0)),
            pl.BlockSpec((1, cout), lambda i: (0, 0)),
            pl.BlockSpec((1, cout), lambda i: (0, 0)),
        ],
        out_specs=pl.BlockSpec((1, h_out, w_out, cout), lambda i: (i, 0, 0, 0)),
        out_shape=jax.ShapeDtypeStruct((n, h_out, w_out, cout), jnp.float32),
        scratch_shapes=[pltpu.VMEM((m_rows, cp), jnp.float32)],
        compiler_params=pltpu.CompilerParams(
            dimension_semantics=("parallel",),
            vmem_limit_bytes=vmem_limit),
    )(x_flat, w_t, scale, shift)

    # NHWC -> NCHW (module contract); the output here is already cropped.
    return jnp.transpose(y, (0, 3, 1, 2))


# -----------------------------------------------------------------------------
# Pure-JAX reference (same bf16-rounded operands as the kernel, f32 math)
# -----------------------------------------------------------------------------
def _reference(x_nchw, conv_w, conv_b, gamma, beta, pad, use_activation):
    xb = x_nchw.astype(jnp.bfloat16).astype(jnp.float32)
    wb = conv_w.astype(jnp.bfloat16).astype(jnp.float32)
    out = jax.lax.conv_general_dilated(
        xb, wb, window_strides=(1, 1), padding=[(pad, pad), (pad, pad)],
        dimension_numbers=("NCHW", "OIHW", "NCHW"),
        precision=jax.lax.Precision.HIGHEST)
    out = out + conv_b.reshape(1, -1, 1, 1)
    mean = jnp.mean(out, axis=(0, 2, 3), keepdims=True)
    var = jnp.mean(jnp.square(out - mean), axis=(0, 2, 3), keepdims=True)
    out = (out - mean) * jax.lax.rsqrt(var + BN_EPS)
    out = out * gamma.reshape(1, -1, 1, 1) + beta.reshape(1, -1, 1, 1)
    if use_activation:
        out = jnp.maximum(out, 0.0)
    return out


if __name__ == "__main__":
    # ConvBlock(in_channels=4, out_channels=8, kernel_size=3, padding_size=1)
    N, CIN, H, W = 2, 4, 16, 16
    COUT, KS, PAD = 8, 3, 1

    key = jax.random.PRNGKey(0)
    kx, kw_, kb = jax.random.split(key, 3)

    x = jax.random.normal(kx, (N, CIN, H, W), dtype=jnp.float32)

    # Conv2d-style init (kaiming-uniform-like bounds, as in PyTorch defaults)
    fan_in = CIN * KS * KS
    bound = 1.0 / np.sqrt(fan_in)
    conv_w = jax.random.uniform(kw_, (COUT, CIN, KS, KS),
                                minval=-bound, maxval=bound, dtype=jnp.float32)
    conv_b = jax.random.uniform(kb, (COUT,), minval=-bound, maxval=bound,
                                dtype=jnp.float32)
    bn_gamma = jnp.ones((COUT,), jnp.float32)   # BatchNorm2d default init
    bn_beta = jnp.zeros((COUT,), jnp.float32)

    out = conv_block_forward(x, conv_w, conv_b, bn_gamma, bn_beta,
                             kernel_size=KS, padding_size=PAD,
                             use_activation=True)
    out = jax.block_until_ready(out)

    ref = _reference(x, conv_w, conv_b, bn_gamma, bn_beta, PAD, True)
    np.testing.assert_allclose(np.asarray(out), np.asarray(ref),
                               rtol=2e-3, atol=2e-3)

    print("KERNEL_OK")
</pallas_src>

<mosaic_0001>
module attributes {stable_mosaic.version = 11 : i64} {
  func.func @_conv_stats_kernel(%arg0: i32, %arg1: memref<1x328x4xbf16, #tpu.memory_space<vmem>>, %arg2: memref<3x3x4x128xbf16, #tpu.memory_space<vmem>>, %arg3: memref<288x1xf32, #tpu.memory_space<vmem>>, %arg4: memref<1x2x128xf32, #tpu.memory_space<vmem>>, %arg5: memref<288x128xf32, #tpu.memory_space<vmem>>) attributes {dimension_semantics = [#tpu.dimension_semantics<parallel>], iteration_bounds = array<i64: 2>, scalar_prefetch = 0 : i64, scratch_operands = 1 : i64, tpu.core_type = #tpu.core_type<tc>, window_params = [{transform_indices = @transform_0, window_bounds = array<i64: 1, 328, 4>}, {pipeline_mode = #tpu.pipeline_mode<synchronous>, transform_indices = @transform_1, window_bounds = array<i64: 3, 3, 4, 128>}, {pipeline_mode = #tpu.pipeline_mode<synchronous>, transform_indices = @transform_2, window_bounds = array<i64: 288, 1>}, {transform_indices = @transform_3, window_bounds = array<i64: 1, 2, 128>}]} {
    %c0 = arith.constant 0 : index
    %c0_0 = arith.constant 0 : index
    %c0_1 = arith.constant 0 : index
    %0 = vector.load %arg1[%c0, %c0_0, %c0_1] : memref<1x328x4xbf16, #tpu.memory_space<vmem>>, vector<1x328x4xbf16>
    %1 = vector.shape_cast %0 : vector<1x328x4xbf16> to vector<328x4xbf16>
    %2 = vector.extract_strided_slice %1 {offsets = [0, 0], sizes = [288, 4], strides = [1, 1]} : vector<328x4xbf16> to vector<288x4xbf16>
    %c0_2 = arith.constant 0 : index
    %c0_3 = arith.constant 0 : index
    %c0_4 = arith.constant 0 : index
    %c0_5 = arith.constant 0 : index
    %3 = vector.load %arg2[%c0_2, %c0_3, %c0_4, %c0_5] : memref<3x3x4x128xbf16, #tpu.memory_space<vmem>>, vector<1x1x4x128xbf16>
    %4 = vector.shape_cast %3 : vector<1x1x4x128xbf16> to vector<4x128xbf16>
    %cst = arith.constant dense<0.000000e+00> : vector<288x128xf32>
    %5 = tpu.matmul %2, %4, %cst {dimension_numbers = #tpu.dot_dimension_numbers<[1], [0], [0], [1], [0, 0, 1, 1], [], []>} : vector<288x4xbf16>, vector<4x128xbf16>, vector<288x128xf32> -> vector<288x128xf32>
    %c0_6 = arith.constant 0 : index
    %c0_7 = arith.constant 0 : index
    %6 = vector.load %arg5[%c0_6, %c0_7] : memref<288x128xf32, #tpu.memory_space<vmem>>, vector<288x128xf32>
    tpu.vector_store %arg5[%c0_6, %c0_7], %5 {strides = array<i32>} : memref<288x128xf32, #tpu.memory_space<vmem>>, vector<288x128xf32>,
    %7 = vector.extract_strided_slice %1 {offsets = [1, 0], sizes = [288, 4], strides = [1, 1]} : vector<328x4xbf16> to vector<288x4xbf16>
    %c0_8 = arith.constant 0 : index
    %c1 = arith.constant 1 : index
    %c0_9 = arith.constant 0 : index
    %c0_10 = arith.constant 0 : index
    %8 = vector.load %arg2[%c0_8, %c1, %c0_9, %c0_10] : memref<3x3x4x128xbf16, #tpu.memory_space<vmem>>, vector<1x1x4x128xbf16>
    %9 = vector.shape_cast %8 : vector<1x1x4x128xbf16> to vector<4x128xbf16>
    %cst_11 = arith.constant dense<0.000000e+00> : vector<288x128xf32>
    %10 = tpu.matmul %7, %9, %cst_11 {dimension_numbers = #tpu.dot_dimension_numbers<[1], [0], [0], [1], [0, 0, 1, 1], [], []>} : vector<288x4xbf16>, vector<4x128xbf16>, vector<288x128xf32> -> vector<288x128xf32>
    %c0_12 = arith.constant 0 : index
    %c0_13 = arith.constant 0 : index
    %11 = vector.load %arg5[%c0_12, %c0_13] : memref<288x128xf32, #tpu.memory_space<vmem>>, vector<288x128xf32>
    %12 = arith.addf %11, %10 : vector<288x128xf32>
    %c0_14 = arith.constant 0 : index
    %c0_15 = arith.constant 0 : index
    %13 = vector.load %arg5[%c0_14, %c0_15] : memref<288x128xf32, #tpu.memory_space<vmem>>, vector<288x128xf32>
    tpu.vector_store %arg5[%c0_14, %c0_15], %12 {strides = array<i32>} : memref<288x128xf32, #tpu.memory_space<vmem>>, vector<288x128xf32>,
    %14 = vector.extract_strided_slice %1 {offsets = [2, 0], sizes = [288, 4], strides = [1, 1]} : vector<328x4xbf16> to vector<288x4xbf16>
    %c0_16 = arith.constant 0 : index
    %c2 = arith.constant 2 : index
    %c0_17 = arith.constant 0 : index
    %c0_18 = arith.constant 0 : index
    %15 = vector.load %arg2[%c0_16, %c2, %c0_17, %c0_18] : memref<3x3x4x128xbf16, #tpu.memory_space<vmem>>, vector<1x1x4x128xbf16>
    %16 = vector.shape_cast %15 : vector<1x1x4x128xbf16> to vector<4x128xbf16>
    %cst_19 = arith.constant dense<0.000000e+00> : vector<288x128xf32>
    %17 = tpu.matmul %14, %16, %cst_19 {dimension_numbers = #tpu.dot_dimension_numbers<[1], [0], [0], [1], [0, 0, 1, 1], [], []>} : vector<288x4xbf16>, vector<4x128xbf16>, vector<288x128xf32> -> vector<288x128xf32>
    %c0_20 = arith.constant 0 : index
    %c0_21 = arith.constant 0 : index
    %18 = vector.load %arg5[%c0_20, %c0_21] : memref<288x128xf32, #tpu.memory_space<vmem>>, vector<288x128xf32>
    %19 = arith.addf %18, %17 : vector<288x128xf32>
    %c0_22 = arith.constant 0 : index
    %c0_23 = arith.constant 0 : index
    %20 = vector.load %arg5[%c0_22, %c0_23] : memref<288x128xf32, #tpu.memory_space<vmem>>, vector<288x128xf32>
    tpu.vector_store %arg5[%c0_22, %c0_23], %19 {strides = array<i32>} : memref<288x128xf32, #tpu.memory_space<vmem>>, vector<288x128xf32>,
    %21 = vector.extract_strided_slice %1 {offsets = [18, 0], sizes = [288, 4], strides = [1, 1]} : vector<328x4xbf16> to vector<288x4xbf16>
    %c1_24 = arith.constant 1 : index
    %c0_25 = arith.constant 0 : index
    %c0_26 = arith.constant 0 : index
    %c0_27 = arith.constant 0 : index
    %22 = vector.load %arg2[%c1_24, %c0_25, %c0_26, %c0_27] : memref<3x3x4x128xbf16, #tpu.memory_space<vmem>>, vector<1x1x4x128xbf16>
    %23 = vector.shape_cast %22 : vector<1x1x4x128xbf16> to vector<4x128xbf16>
    %cst_28 = arith.constant dense<0.000000e+00> : vector<288x128xf32>
    %24 = tpu.matmul %21, %23, %cst_28 {dimension_numbers = #tpu.dot_dimension_numbers<[1], [0], [0], [1], [0, 0, 1, 1], [], []>} : vector<288x4xbf16>, vector<4x128xbf16>, vector<288x128xf32> -> vector<288x128xf32>
    %c0_29 = arith.constant 0 : index
    %c0_30 = arith.constant 0 : index
    %25 = vector.load %arg5[%c0_29, %c0_30] : memref<288x128xf32, #tpu.memory_space<vmem>>, vector<288x128xf32>
    %26 = arith.addf %25, %24 : vector<288x128xf32>
    %c0_31 = arith.constant 0 : index
    %c0_32 = arith.constant 0 : index
    %27 = vector.load %arg5[%c0_31, %c0_32] : memref<288x128xf32, #tpu.memory_space<vmem>>, vector<288x128xf32>
    tpu.vector_store %arg5[%c0_31, %c0_32], %26 {strides = array<i32>} : memref<288x128xf32, #tpu.memory_space<vmem>>, vector<288x128xf32>,
    %28 = vector.extract_strided_slice %1 {offsets = [19, 0], sizes = [288, 4], strides = [1, 1]} : vector<328x4xbf16> to vector<288x4xbf16>
    %c1_33 = arith.constant 1 : index
    %c1_34 = arith.constant 1 : index
    %c0_35 = arith.constant 0 : index
    %c0_36 = arith.constant 0 : index
    %29 = vector.load %arg2[%c1_33, %c1_34, %c0_35, %c0_36] : memref<3x3x4x128xbf16, #tpu.memory_space<vmem>>, vector<1x1x4x128xbf16>
    %30 = vector.shape_cast %29 : vector<1x1x4x128xbf16> to vector<4x128xbf16>
    %cst_37 = arith.constant dense<0.000000e+00> : vector<288x128xf32>
    %31 = tpu.matmul %28, %30, %cst_37 {dimension_numbers = #tpu.dot_dimension_numbers<[1], [0], [0], [1], [0, 0, 1, 1], [], []>} : vector<288x4xbf16>, vector<4x128xbf16>, vector<288x128xf32> -> vector<288x128xf32>
    %c0_38 = arith.constant 0 : index
    %c0_39 = arith.constant 0 : index
    %32 = vector.load %arg5[%c0_38, %c0_39] : memref<288x128xf32, #tpu.memory_space<vmem>>, vector<288x128xf32>
    %33 = arith.addf %32, %31 : vector<288x128xf32>
    %c0_40 = arith.constant 0 : index
    %c0_41 = arith.constant 0 : index
    %34 = vector.load %arg5[%c0_40, %c0_41] : memref<288x128xf32, #tpu.memory_space<vmem>>, vector<288x128xf32>
    tpu.vector_store %arg5[%c0_40, %c0_41], %33 {strides = array<i32>} : memref<288x128xf32, #tpu.memory_space<vmem>>, vector<288x128xf32>,
    %35 = vector.extract_strided_slice %1 {offsets = [20, 0], sizes = [288, 4], strides = [1, 1]} : vector<328x4xbf16> to vector<288x4xbf16>
    %c1_42 = arith.constant 1 : index
    %c2_43 = arith.constant 2 : index
    %c0_44 = arith.constant 0 : index
    %c0_45 = arith.constant 0 : index
    %36 = vector.load %arg2[%c1_42, %c2_43, %c0_44, %c0_45] : memref<3x3x4x128xbf16, #tpu.memory_space<vmem>>, vector<1x1x4x128xbf16>
    %37 = vector.shape_cast %36 : vector<1x1x4x128xbf16> to vector<4x128xbf16>
    %cst_46 = arith.constant dense<0.000000e+00> : vector<288x128xf32>
    %38 = tpu.matmul %35, %37, %cst_46 {dimension_numbers = #tpu.dot_dimension_numbers<[1], [0], [0], [1], [0, 0, 1, 1], [], []>} : vector<288x4xbf16>, vector<4x128xbf16>, vector<288x128xf32> -> vector<288x128xf32>
    %c0_47 = arith.constant 0 : index
    %c0_48 = arith.constant 0 : index
    %39 = vector.load %arg5[%c0_47, %c0_48] : memref<288x128xf32, #tpu.memory_space<vmem>>, vector<288x128xf32>
    %40 = arith.addf %39, %38 : vector<288x128xf32>
    %c0_49 = arith.constant 0 : index
    %c0_50 = arith.constant 0 : index
    %41 = vector.load %arg5[%c0_49, %c0_50] : memref<288x128xf32, #tpu.memory_space<vmem>>, vector<288x128xf32>
    tpu.vector_store %arg5[%c0_49, %c0_50], %40 {strides = array<i32>} : memref<288x128xf32, #tpu.memory_space<vmem>>, vector<288x128xf32>,
    %42 = vector.extract_strided_slice %1 {offsets = [36, 0], sizes = [288, 4], strides = [1, 1]} : vector<328x4xbf16> to vector<288x4xbf16>
    %c2_51 = arith.constant 2 : index
    %c0_52 = arith.constant 0 : index
    %c0_53 = arith.constant 0 : index
    %c0_54 = arith.constant 0 : index
    %43 = vector.load %arg2[%c2_51, %c0_52, %c0_53, %c0_54] : memref<3x3x4x128xbf16, #tpu.memory_space<vmem>>, vector<1x1x4x128xbf16>
    %44 = vector.shape_cast %43 : vector<1x1x4x128xbf16> to vector<4x128xbf16>
    %cst_55 = arith.constant dense<0.000000e+00> : vector<288x128xf32>
    %45 = tpu.matmul %42, %44, %cst_55 {dimension_numbers = #tpu.dot_dimension_numbers<[1], [0], [0], [1], [0, 0, 1, 1], [], []>} : vector<288x4xbf16>, vector<4x128xbf16>, vector<288x128xf32> -> vector<288x128xf32>
    %c0_56 = arith.constant 0 : index
    %c0_57 = arith.constant 0 : index
    %46 = vector.load %arg5[%c0_56, %c0_57] : memref<288x128xf32, #tpu.memory_space<vmem>>, vector<288x128xf32>
    %47 = arith.addf %46, %45 : vector<288x128xf32>
    %c0_58 = arith.constant 0 : index
    %c0_59 = arith.constant 0 : index
    %48 = vector.load %arg5[%c0_58, %c0_59] : memref<288x128xf32, #tpu.memory_space<vmem>>, vector<288x128xf32>
    tpu.vector_store %arg5[%c0_58, %c0_59], %47 {strides = array<i32>} : memref<288x128xf32, #tpu.memory_space<vmem>>, vector<288x128xf32>,
    %49 = vector.extract_strided_slice %1 {offsets = [37, 0], sizes = [288, 4], strides = [1, 1]} : vector<328x4xbf16> to vector<288x4xbf16>
    %c2_60 = arith.constant 2 : index
    %c1_61 = arith.constant 1 : index
    %c0_62 = arith.constant 0 : index
    %c0_63 = arith.constant 0 : index
    %50 = vector.load %arg2[%c2_60, %c1_61, %c0_62, %c0_63] : memref<3x3x4x128xbf16, #tpu.memory_space<vmem>>, vector<1x1x4x128xbf16>
    %51 = vector.shape_cast %50 : vector<1x1x4x128xbf16> to vector<4x128xbf16>
    %cst_64 = arith.constant dense<0.000000e+00> : vector<288x128xf32>
    %52 = tpu.matmul %49, %51, %cst_64 {dimension_numbers = #tpu.dot_dimension_numbers<[1], [0], [0], [1], [0, 0, 1, 1], [], []>} : vector<288x4xbf16>, vector<4x128xbf16>, vector<288x128xf32> -> vector<288x128xf32>
    %c0_65 = arith.constant 0 : index
    %c0_66 = arith.constant 0 : index
    %53 = vector.load %arg5[%c0_65, %c0_66] : memref<288x128xf32, #tpu.memory_space<vmem>>, vector<288x128xf32>
    %54 = arith.addf %53, %52 : vector<288x128xf32>
    %c0_67 = arith.constant 0 : index
    %c0_68 = arith.constant 0 : index
    %55 = vector.load %arg5[%c0_67, %c0_68] : memref<288x128xf32, #tpu.memory_space<vmem>>, vector<288x128xf32>
    tpu.vector_store %arg5[%c0_67, %c0_68], %54 {strides = array<i32>} : memref<288x128xf32, #tpu.memory_space<vmem>>, vector<288x128xf32>,
    %56 = vector.extract_strided_slice %1 {offsets = [38, 0], sizes = [288, 4], strides = [1, 1]} : vector<328x4xbf16> to vector<288x4xbf16>
    %c2_69 = arith.constant 2 : index
    %c2_70 = arith.constant 2 : index
    %c0_71 = arith.constant 0 : index
    %c0_72 = arith.constant 0 : index
    %57 = vector.load %arg2[%c2_69, %c2_70, %c0_71, %c0_72] : memref<3x3x4x128xbf16, #tpu.memory_space<vmem>>, vector<1x1x4x128xbf16>
    %58 = vector.shape_cast %57 : vector<1x1x4x128xbf16> to vector<4x128xbf16>
    %cst_73 = arith.constant dense<0.000000e+00> : vector<288x128xf32>
    %59 = tpu.matmul %56, %58, %cst_73 {dimension_numbers = #tpu.dot_dimension_numbers<[1], [0], [0], [1], [0, 0, 1, 1], [], []>} : vector<288x4xbf16>, vector<4x128xbf16>, vector<288x128xf32> -> vector<288x128xf32>
    %c0_74 = arith.constant 0 : index
    %c0_75 = arith.constant 0 : index
    %60 = vector.load %arg5[%c0_74, %c0_75] : memref<288x128xf32, #tpu.memory_space<vmem>>, vector<288x128xf32>
    %61 = arith.addf %60, %59 : vector<288x128xf32>
    %c0_76 = arith.constant 0 : index
    %c0_77 = arith.constant 0 : index
    %62 = vector.load %arg5[%c0_76, %c0_77] : memref<288x128xf32, #tpu.memory_space<vmem>>, vector<288x128xf32>
    tpu.vector_store %arg5[%c0_76, %c0_77], %61 {strides = array<i32>} : memref<288x128xf32, #tpu.memory_space<vmem>>, vector<288x128xf32>,
    %c0_78 = arith.constant 0 : index
    %c0_79 = arith.constant 0 : index
    %63 = vector.load %arg5[%c0_78, %c0_79] : memref<288x128xf32, #tpu.memory_space<vmem>>, vector<288x128xf32>
    %c0_80 = arith.constant 0 : index
    %c0_81 = arith.constant 0 : index
    %64 = vector.load %arg3[%c0_80, %c0_81] : memref<288x1xf32, #tpu.memory_space<vmem>>, vector<288x1xf32>
    %65 = vector.broadcast %64 : vector<288x1xf32> to vector<288x128xf32>
    %66 = arith.mulf %63, %65 : vector<288x128xf32>
    %cst_82 = arith.constant dense<0.000000e+00> : vector<128xf32>
    %67 = vector.multi_reduction <add>, %66, %cst_82 [0] : vector<288x128xf32> to vector<128xf32>
    %68 = vector.shape_cast %67 : vector<128xf32> to vector<1x128xf32>
    %c0_83 = arith.constant 0 : index
    %c0_84 = arith.constant 0 : index
    %c0_85 = arith.constant 0 : index
    %69 = vector.load %arg4[%c0_83, %c0_84, %c0_85] : memref<1x2x128xf32, #tpu.memory_space<vmem>>, vector<1x1x128xf32>
    %70 = vector.shape_cast %69 : vector<1x1x128xf32> to vector<1x128xf32>
    %71 = vector.shape_cast %68 : vector<1x128xf32> to vector<1x1x128xf32>
    tpu.vector_store %arg4[%c0_83, %c0_84, %c0_85], %71 {strides = array<i32>} : memref<1x2x128xf32, #tpu.memory_space<vmem>>, vector<1x1x128xf32>,
    %72 = arith.mulf %66, %66 : vector<288x128xf32>
    %cst_86 = arith.constant dense<0.000000e+00> : vector<128xf32>
    %73 = vector.multi_reduction <add>, %72, %cst_86 [0] : vector<288x128xf32> to vector<128xf32>
    %74 = vector.shape_cast %73 : vector<128xf32> to vector<1x128xf32>
    %c0_87 = arith.constant 0 : index
    %c1_88 = arith.constant 1 : index
    %c0_89 = arith.constant 0 : index
    %75 = vector.load %arg4[%c0_87, %c1_88, %c0_89] : memref<1x2x128xf32, #tpu.memory_space<vmem>>, vector<1x1x128xf32>
    %76 = vector.shape_cast %75 : vector<1x1x128xf32> to vector<1x128xf32>
    %77 = vector.shape_cast %74 : vector<1x128xf32> to vector<1x1x128xf32>
    tpu.vector_store %arg4[%c0_87, %c1_88, %c0_89], %77 {strides = array<i32>} : memref<1x2x128xf32, #tpu.memory_space<vmem>>, vector<1x1x128xf32>,
    return
  }
  func.func @transform_0(%arg0: i32) -> (i32, i32, i32) {
    %c0_i32 = arith.constant 0 : i32
    %c0_i32_0 = arith.constant 0 : i32
    %c0_i32_1 = arith.constant 0 : i32
    return %arg0, %c0_i32, %c0_i32_0 : i32, i32, i32
  }
  func.func @transform_1(%arg0: i32) -> (i32, i32, i32, i32) {
    %c0_i32 = arith.constant 0 : i32
    %c0_i32_0 = arith.constant 0 : i32
    %c0_i32_1 = arith.constant 0 : i32
    %c0_i32_2 = arith.constant 0 : i32
    %c0_i32_3 = arith.constant 0 : i32
    return %c0_i32, %c0_i32_0, %c0_i32_1, %c0_i32_2 : i32, i32, i32, i32
  }
  func.func @transform_2(%arg0: i32) -> (i32, i32) {
    %c0_i32 = arith.constant 0 : i32
    %c0_i32_0 = arith.constant 0 : i32
    %c0_i32_1 = arith.constant 0 : i32
    return %c0_i32, %c0_i32_0 : i32, i32
  }
  func.func @transform_3(%arg0: i32) -> (i32, i32, i32) {
    %c0_i32 = arith.constant 0 : i32
    %c0_i32_0 = arith.constant 0 : i32
    %c0_i32_1 = arith.constant 0 : i32
    return %arg0, %c0_i32, %c0_i32_0 : i32, i32, i32
  }
}

</mosaic_0001>

<bundles_post_ra>
// kernel: tpu_custom_call.1
= control target key start
LH: loop header
LB: loop body
LE: loop exit
PB: predicated region body
PF: predicated region fallthrough
CT: control target
= control target key end

     0   :  { %8 = vsyncpa [#allocation4], 0  ;;  %s5179_s0 = inlined_call_operand.vmem [shape: bf16[2,328,4], index: 0, kind: input, shape index: {}]   ;;  %s5180_s1 = inlined_call_operand.vmem [shape: bf16[3,3,4,128], index: 1, kind: input, shape index: {}]   ;;  %s5181_s2 = inlined_call_operand.vmem [shape: f32[288,1], index: 2, kind: input, shape index: {}]   ;;  %s5182_s3 = inlined_call_operand.hbm [shape: f32[2,2,128], index: 3, kind: output, shape index: {}]  }
   0x1   :  { %10 = vsyncpa [#allocation4 + $0x1], 0  ;;  %s3882_s12 = smov 0   ;;  %s3884_s13 = smov 0  }
   0x2   :  { %s3886_s14 = smov 0   ;;  %s3888_s15 = smov 0  }
   0x3 LB: > { %s3903_s16 = sadd.s32 4294967295, %s3859_s15   ;;  %s3451_s17 = sadd.s32 4294967294, %s3859_s15   ;;  %s3859_s15 = sphi %s3888_s15, %s5271_s15   ;;  %s3855_s14 = sphi %s3886_s14, %s5270_s14   ;;  %s3851_s13 = sphi %s3884_s13, %s5269_s13   ;;  %s3847_s12 = sphi %s3882_s12, %s5268_s12  }
   0x4   : > { %s3907_s18 = sadd.s32 1, %s3859_s15   ;;  %s91_s19 = sadd.s32 1, %s3855_s14 }
   0x5   : > { %s88_s20 = ssub.s32 %s3859_s15, %s3907_s18  ;;  %p101_p0 = scmp.ne.s32.totalorder %s3855_s14, %s3851_s13 }
   0x6   : > { %p89_p1 = scmp.eq.s32.totalorder %s88_s20, 0  ;;  %p102_p2 = scmp.eq.s32.totalorder %s3903_s16, 1 }
   0x7   : > { %p107_p3 = scmp.ne.s32.totalorder %s3851_s13, %s3847_s12  ;;  %p108_p4 = scmp.eq.s32.totalorder %s3451_s17, 1 }
   0x8   : > { %s3918_s21 = scalar_select %p89_p1, %s3855_s14, %s91_s19  }
   0x9   : > { %p3920_p5 = por %p102_p2, %p101_p0  ;;  %p3924_p6 = por %p108_p4, %p107_p3 }
   0xa   : > { %p3454_p7 = scmp.ge.s32.totalorder %s3859_s15, 1  ;;  %p140_p8 = scmp.lt.s32.totalorder %s3859_s15, 3 }
   0xc   : > { %p141_p9 = pnand %p3454_p7, %p140_p8 }
   0xe   : > { %144 = sbr.rel (%p141_p9) target bundleno = 834 (0x342), region = 32 }
  0x13   : > { %v211_v0 = vld [vmem:[%s5180_s1] sm:$0x3]  ;;  %vm357_vm0 = vcmask 1041408   ;;  %p164_p10 = scmp.lt.s32.totalorder %s3903_s16, 1  ;;  %v3566_v2 = vld [vmem:[%s5180_s1 + $0x4] sm:$0x3] }
  0x14   : > { %v359_v1 = vsel %vm357_vm0, %v211_v0, 0  ;;  %v3547_v3 = vld [vmem:[%s5180_s1 + $0x2] sm:$0x3]  ;;  %v991_v4 = vsel %vm357_vm0, %v3566_v2, 0  ;;  %v3604_v6 = vld [vmem:[%s5180_s1 + $0x8] sm:$0x3] }
  0x15   : > { %3731 = vmatpush.bf16.msra.mxu1 %v359_v1  ;;  %3732 = vmatpush.bf16.msra.mxu2 %v359_v1  ;;  %s165_s30 = scalar_select %p164_p10, %s3903_s16, 1  ;;  %v687_v5 = vsel %vm357_vm0, %v3547_v3, 0  ;;  %v1571_v7 = vsel %vm357_vm0, %v3604_v6, 0  ;;  %vm302_vm1 = vcmask 31744   ;;  %v3585_v12 = vld [vmem:[%s5180_s1 + $0x6] sm:$0x3] }
  0x16   : > { %368 = vmatpush.bf16.msra.mxu0 %v359_v1  ;;  %3733 = vmatpush.bf16.msra.mxu3 %v359_v1  ;;  %v1219_v13 = vsel %vm357_vm0, %v3585_v12, 0  ;;  %vm898_vm2 = vcmask 1046528   ;;  %v3642_v28 = vld [vmem:[%s5180_s1 + $0xc] sm:$0x3]  ;;  %v3661_v30 = vld [vmem:[%s5180_s1 + $0xe] sm:$0x3] }
  0x17   : > { %s3734_s6 = smul.u32 164, %s165_s30  ;;  %v2103_v29 = vsel %vm357_vm0, %v3642_v28, 0  ;;  %v3623_v31 = vld [vmem:[%s5180_s1 + $0xa] sm:$0x3]  ;;  %v2455_v32 = vsel %vm357_vm0, %v3661_v30, 0  ;;  %vm1782_vm6 = vcmask 1045504  }
  0x18   : > { %v1875_v33 = vsel %vm357_vm0, %v3623_v31, 0  ;;  %v3680_v34 = vld [vmem:[%s5180_s1 + $0x10] sm:$0x3]  ;;  %vm501_vm3 = vsmask.f32 7424  ;;  %vm2666_vm7 = vcmask 1044480  }
  0x19   : > { %1000 = vmatpush.bf16.msrb.mxu2 %v991_v4  ;;  %696 = vmatpush.bf16.msrb.mxu1 %v687_v5  ;;  %s3951_s9 = scalar_lea.vmem %s5179_s0, %s3734_s6  ;;  %v2759_v35 = vsel %vm357_vm0, %v3680_v34, 0  ;;  %vm1430_vm4 = vsmask.f32 6400  ;;  %vm2314_vm5 = vsmask.f32 5376  ;;  %s3700_s7 = sshll.u32 %s3903_s16, 1 }
  0x1a   : > { %1580 = vmatpush.bf16.msrb.mxu0 %v1571_v7  ;;  %v3954_v8 = vld [vmem:[%s3951_s9 + $0x28] sm:$0xff]  ;;  %v3957_v9 = vld [vmem:[%s3951_s9 + $0x50] sm:$0xff]  ;;  %v3960_v10 = vld [vmem:[%s3951_s9] sm:$0xff]  ;;  %1228 = vmatpush.bf16.msrb.mxu3 %v1219_v13  ;;  %s3387_s11 = scalar_lea.hbm %s5182_s3, %s3700_s7  ;;  %s3817_s28 = scalar_lea.hbm %s5182_s3, 4 }
  0x1b   : > { %3534 = vmatmul.msk.bf16.vlgmr.msra.gmra.mxu1 %vm302_vm1, %v3954_v8  ;;  %3539 = vmatmul.msk.bf16.vlgmr.msra.gmra.mxu2 %vm302_vm1, %v3957_v9  ;;  %v3967_v11 = vld [vmem:[%s3951_s9 + $0x78] sm:$0xff]  ;;  %v3978_v14 = vld [vmem:[%s3951_s9 + $0x30] sm:$0xff]  ;;  %v3984_v16 = vld [vmem:[%s3951_s9 + $0x8] sm:$0xff]  ;;  %v504_v41 = vshll.u32 %v3960_v10, 16  ;;  %v502_v46 = vshrl.u32 %v3960_v10, 16  ;;  %v899_v54 = vrot.slane %v3960_v10, 1 }
  0x1c   : > { %3529 = vmatmul.msk.bf16.vlgmr.msra.gmra.mxu0 %vm302_vm1, %v3960_v10  ;;  %3544 = vmatmul.msk.bf16.vlgmr.msra.gmra.mxu3 %vm302_vm1, %v3967_v11  ;;  %v3981_v15 = vld [vmem:[%s3951_s9 + $0x58] sm:$0xff]  ;;  %v3987_v17 = vld [vmem:[%s3951_s9 + $0x80] sm:$0xff]  ;;  %v3705_v20 = vld [vmem:[%s3951_s9 + $0x10] sm:$0xff]  ;;  %v900_v22 = vrot.slane %v3984_v16, 1  ;;  %v508_v42 = vshll.u32 %v3984_v16, 16  ;;  %v512_v43 = vshrl.u32 %v3984_v16, 16 }
  0x1d   : > { %v3998_v18 = vld [vmem:[%s3951_s9 + $0x38] sm:$0xff]  ;;  %v4001_v19 = vld [vmem:[%s3951_s9 + $0x60] sm:$0xff]  ;;  %v4005_v21 = vld [vmem:[%s3951_s9 + $0x88] sm:$0xff]  ;;  %v902_v23 = vrot.slane %v3705_v20, 1  ;;  %2112 = vmatpush.bf16.msra.mxu2 %v2103_v29  ;;  %1884 = vmatpush.bf16.msra.mxu1 %v1875_v33  ;;  %v4064_v44 = vshll.u32 %v3705_v20, 16  ;;  %v4066_v45 = vshrl.u32 %v3705_v20, 16 }
  0x1e   : > { %v4016_v24 = vld [vmem:[%s3951_s9 + $0x40] sm:$0xff]  ;;  %v4019_v25 = vld [vmem:[%s3951_s9 + $0x68] sm:$0xff]  ;;  %v3706_v26 = vld [vmem:[%s3951_s9 + $0x18] sm:$0xff]  ;;  %2464 = vmatpush.bf16.msra.mxu3 %v2455_v32  ;;  %2768 = vmatpush.bf16.msra.mxu0 %v2759_v35  ;;  %v506_v47 = vrot.slane %v504_v41, 1  ;;  %v1431_v48 = vrot.slane %v512_v43, 1  ;;  %v1432_v49 = vrot.slane %v508_v42, 2  ;;  %v901_v59 = vsel %vm898_vm2, %v899_v54, %v900_v22 }
  0x1f   : > { %v4023_v27 = vsel %vm898_vm2, %v900_v22, %v902_v23  ;;  %v904_v36 = vrot.slane %v3706_v26, 1  ;;  %v4049_v37 = vld [vmem:[%s3951_s9 + $0x48] sm:$0xff]  ;;  %v4052_v38 = vld [vmem:[%s3951_s9 + $0x70] sm:$0xff]  ;;  %v3707_v39 = vld [vmem:[%s3951_s9 + $0x20] sm:$0xff]  ;;  %v1434_v50 = vrot.slane %v4066_v45, 1  ;;  %v1435_v51 = vrot.slane %v4064_v44, 2 }
  0x20   : > { %v507_v52 = vor.u32 %v506_v47, %v502_v46  ;;  %v510_v53 = vrot.slane %v508_v42, 1  ;;  %v1433_v55 = vor.u32 %v1432_v49, %v1431_v48  ;;  %v906_v57 = vrot.slane %v3707_v39, 1  ;;  %s3391_s20 = sshll.u32 %s3387_s11, 4  ;;  %s3392_s20 = int_to_ptr.hbm [resolvable:$true] %s3391_s20 }
  0x21   : > { %v905_v40 = vsel %vm898_vm2, %v902_v23, %v904_v36  ;;  %v1436_v56 = vor.u32 %v1435_v51, %v1434_v50  ;;  %v4080_v62 = vshll.u32 %v3706_v26, 16  ;;  %v4082_v63 = vshrl.u32 %v3706_v26, 16  ;;  %s3811_s24 = sshra.s32 %s3392_s20, 4  ;;  %s3812_s24 = int_to_ptr.hbm [resolvable:$true] %s3811_s24 }
  0x22   : > { %v511_v58 = vsel %vm501_vm3, %v507_v52, %v510_v53  ;;  %v907_v61 = vsel %vm898_vm2, %v904_v36, %v906_v57  ;;  %v514_v2 = vor.u32 %v512_v43, %v510_v53  ;;  %v517_v3 = vrot.slane %v4064_v44, 1  ;;  %s3813_s25 = scalar_lea.hbm %s3812_s24, 2  ;;  %p3818_p0 = scmp.lt.s32.totalorder %s3812_s24, %s5182_s3 }
  0x23   : > { %v1437_v60 = vsel %vm1430_vm4, %v1433_v55, %v1436_v56  ;;  %v1438_v0 = vrot.slane %v4082_v63, 1  ;;  %v1439_v1 = vrot.slane %v4080_v62, 2  ;;  %v908_v5 = vrot.slane %v3954_v8, 1  ;;  %p3814_p11 = scmp.ne.s32.totalorder %s3812_s24, %s3813_s25  ;;  %p3819_p1 = scmp.lt.s32.totalorder %s3817_s28, %s3813_s25 }
  0x24   : > { %v518_v6 = vsel %vm501_vm3, %v514_v2, %v517_v3  ;;  %v4096_v12 = vshll.u32 %v3707_v39, 16  ;;  %v4098_v13 = vshrl.u32 %v3707_v39, 16  ;;  %v521_v22 = vor.u32 %v4066_v45, %v517_v3 }
  0x25   : > { %v1440_v4 = vor.u32 %v1439_v1, %v1438_v0  ;;  %v909_v10 = vsel %vm898_vm2, %v906_v57, %v908_v5  ;;  %v524_v23 = vrot.slane %v4080_v62, 1  ;;  %v910_v28 = vrot.slane %v3978_v14, 1  ;;  %p3815_p12 = pnand %p3814_p11, %p3920_p5  ;;  %p3820_p2 = por %p3819_p1, %p3818_p0 }
  0x26   : > { %v4115_v31 = vshll.u32 %v3954_v8, 16  ;;  %v4118_v32 = vshrl.u32 %v3954_v8, 16  ;;  %v531_v36 = vrot.slane %v4096_v12, 1  ;;  %v4140_v47 = vshll.u32 %v3978_v14, 16 }
  0x27   : > { %v1441_v7 = vsel %vm1430_vm4, %v1436_v56, %v1440_v4  ;;  %v4109_v30 = vsel %vm898_vm2, %v908_v5, %v910_v28  ;;  %v528_v35 = vor.u32 %v4082_v63, %v524_v23  ;;  %v4143_v48 = vshrl.u32 %v3978_v14, 16  ;;  %p3816_p13 = pneg %p3815_p12 }
  0x28   : > { %5196 = vst [vmem:[#allocation6_spill] sm:$0xff] %v4115_v31  ;;  %v1446_v33 = vrot.slane %v4118_v32, 1  ;;  %v1447_v34 = vrot.slane %v4115_v31, 2  ;;  %v1451_v54 = vrot.slane %v4140_v47, 2  ;;  %v535_v55 = vor.u32 %v4098_v13, %v531_v36 }
  0x29   : > { %5197 = vst [vmem:[#allocation7_spill] sm:$0xff] %v4118_v32  ;;  %v532_v42 = vsel %vm501_vm3, %v528_v35, %v531_v36  ;;  %v1450_v53 = vrot.slane %v4143_v48, 1  ;;  %v4177_v3 = vshll.u32 %v3998_v18, 16  ;;  %p3821_p3 = pnand %p3820_p2, %p3816_p13 }
  0x2a   : > { %5198 = vst [vmem:[#allocation8_spill] sm:$0xff] %v4140_v47 }
  0x2b   : > { %3535 = vmatmul.msk.bf16.gmra.mxu1 %vm302_vm1, %v3978_v14  ;;  %3540 = vmatmul.msk.bf16.gmra.mxu2 %vm302_vm1, %v3981_v15  ;;  %5199 = vst [vmem:[#allocation9_spill] sm:$0xff] %v4143_v48  ;;  %v538_v14 = vrot.slane %v4115_v31, 1  ;;  %v1452_v56 = vor.u32 %v1451_v54, %v1450_v53 }
  0x2c   : > { %3530 = vmatmul.msk.bf16.gmra.mxu0 %vm302_vm1, %v3984_v16  ;;  %3545 = vmatmul.msk.bf16.gmra.mxu3 %vm302_vm1, %v3987_v17  ;;  %v1442_v16 = vrot.slane %v4098_v13, 1  ;;  %5204 = vst [vmem:[#allocation14_spill] sm:$0xff] %v4177_v3 }
  0x3b   : > { %3536 = vmatmul.msk.bf16.gmra.mxu1 %vm302_vm1, %v3998_v18  ;;  %3541 = vmatmul.msk.bf16.gmra.mxu2 %vm302_vm1, %v4001_v19 }
  0x3c   : > { %3531 = vmatmul.msk.bf16.gmra.mxu0 %vm302_vm1, %v3705_v20  ;;  %3546 = vmatmul.msk.bf16.gmra.mxu3 %vm302_vm1, %v4005_v21  ;;  %v1443_v20 = vrot.slane %v4096_v12, 2 }
  0x4b   : > { %3537 = vmatmul.msk.bf16.gmra.mxu1 %vm302_vm1, %v4016_v24  ;;  %3542 = vmatmul.msk.bf16.gmra.mxu2 %vm302_vm1, %v4019_v25 }
  0x4c   : > { %3532 = vmatmul.msk.bf16.gmra.mxu0 %vm302_vm1, %v3706_v26  ;;  %3586 = vmatmul.msk.bf16.vlgmr.msrb.gmra.mxu3 %vm302_vm1, %v4023_v27  ;;  %v1444_v26 = vor.u32 %v1443_v20, %v1442_v16  ;;  %v1455_v20 = vrot.slane %v4177_v3, 2 }
  0x4e   : > { %v1445_v29 = vsel %vm1430_vm4, %v1440_v4, %v1444_v26  ;;  %v4180_v4 = vshrl.u32 %v3998_v18, 16 }
  0x50   : > { %5205 = vst [vmem:[#allocation15_spill] sm:$0xff] %v4180_v4 }
  0x5b   : > { %3538 = vmatmul.msk.bf16.gmra.mxu1 %vm302_vm1, %v4049_v37  ;;  %3543 = vmatmul.msk.bf16.gmra.mxu2 %vm302_vm1, %v4052_v38 }
  0x5c   : > { %3533 = vmatmul.msk.bf16.gmra.mxu0 %vm302_vm1, %v3707_v39  ;;  %3587 = vmatmul.msk.bf16.gmra.mxu3 %vm302_vm1, %v905_v40  ;;  %v1448_v39 = vor.u32 %v1447_v34, %v1446_v33 }
  0x5e   : > { %v1449_v43 = vsel %vm1430_vm4, %v1444_v26, %v1448_v39  ;;  %v1453_v1 = vsel %vm1430_vm4, %v1448_v39, %v1452_v56  ;;  %v4215_v39 = vshll.u32 %v4016_v24, 16 }
  0x60   : > { %5210 = vst [vmem:[#allocation20_spill] sm:$0xff] %v4215_v39 }
  0x6b   : > { %3548 = vmatmul.msk.bf16.vlgmr.msrb.gmra.mxu1 %vm302_vm1, %v511_v58  ;;  %3567 = vmatmul.msk.bf16.vlgmr.msrb.gmra.mxu2 %vm302_vm1, %v901_v59  ;;  %v914_v58 = vrot.slane %v4016_v24, 1 }
  0x6c   : > { %3605 = vmatmul.msk.bf16.vlgmr.msrb.gmra.mxu0 %vm302_vm1, %v1437_v60  ;;  %3588 = vmatmul.msk.bf16.gmra.mxu3 %vm302_vm1, %v907_v61  ;;  %v539_v60 = vsel %vm501_vm3, %v535_v55, %v538_v14  ;;  %v1459_v55 = vrot.slane %v4215_v39, 2 }
  0x7b   : > { %3549 = vmatmul.msk.bf16.gmra.mxu1 %vm302_vm1, %v518_v6  ;;  %3568 = vmatmul.msk.bf16.gmra.mxu2 %vm302_vm1, %v4023_v27  ;;  %v525_v27 = vsel %vm501_vm3, %v521_v22, %v524_v23  ;;  %v542_v22 = vor.u32 %v4118_v32, %v538_v14 }
  0x7c   : > { %3606 = vmatmul.msk.bf16.gmra.mxu0 %vm302_vm1, %v1441_v7  ;;  %3589 = vmatmul.msk.bf16.gmra.mxu3 %vm302_vm1, %v909_v10 }
  0x8b   : > { %3550 = vmatmul.msk.bf16.gmra.mxu1 %vm302_vm1, %v525_v27  ;;  %3569 = vmatmul.msk.bf16.gmra.mxu2 %vm302_vm1, %v905_v40  ;;  %v912_v40 = vrot.slane %v3998_v18, 1  ;;  %v545_v18 = vrot.slane %v4140_v47, 1 }
  0x8c   : > { %3607 = vmatmul.msk.bf16.gmra.mxu0 %vm302_vm1, %v1445_v29  ;;  %3590 = vmatmul.msk.bf16.gmra.mxu3 %vm302_vm1, %v4109_v30 }
  0x8d   : > { %v4134_v46 = vsel %vm898_vm2, %v910_v28, %v912_v40  ;;  %v4171_v2 = vsel %vm898_vm2, %v912_v40, %v914_v58  ;;  %v916_v28 = vrot.slane %v4049_v37, 1  ;;  %v546_v29 = vsel %vm501_vm3, %v542_v22, %v545_v18 }
  0x8e   : > { %v4218_v40 = vshrl.u32 %v4016_v24, 16  ;;  %v549_v14 = vor.u32 %v4143_v48, %v545_v18  ;;  %v552_v24 = vrot.slane %v4177_v3, 1  ;;  %v4253_v18 = vshll.u32 %v4049_v37, 16 }
  0x8f   : > { %v4208_v36 = vsel %vm898_vm2, %v914_v58, %v916_v28 }
  0x90   : > { %5211 = vst [vmem:[#allocation21_spill] sm:$0xff] %v4218_v40 }
  0x91   : > { %5216 = vst [vmem:[#allocation26_spill] sm:$0xff] %v4253_v18 }
  0x98   : > { %v4127_v41 = vpop.f32.mrf.mxu1 }
  0x99   : > { %v4130_v8 = vpop.f32.mrf.mxu0 }
  0x9b   : > { %3551 = vmatmul.msk.bf16.gmra.mxu1 %vm302_vm1, %v532_v42  ;;  %3570 = vmatmul.msk.bf16.gmra.mxu2 %vm302_vm1, %v907_v61 }
  0x9c   : > { %3608 = vmatmul.msk.bf16.gmra.mxu0 %vm302_vm1, %v1449_v43  ;;  %3591 = vmatmul.msk.bf16.gmra.mxu3 %vm302_vm1, %v4134_v46 }
  0x9e   : > { %v4147_v49 = vpop.f32.mrf.mxu2 }
  0x9f   : > { %5200 = vst [vmem:[#allocation10_spill] sm:$0xff] %v4147_v49  ;;  %v4151_v51 = vpop.f32.mrf.mxu3 }
  0xa0   : > { %v4149_v50 = vpop.f32.mrf.mxu1  ;;  %5201 = vst [vmem:[#allocation11_spill] sm:$0xff] %v4151_v51 }
  0xa1   : > { %v4153_v52 = vpop.f32.mrf.mxu0 }
  0xa6   : > { %v4159_v57 = vpop.f32.mrf.mxu2 }
  0xa7   : > { %5202 = vst [vmem:[#allocation12_spill] sm:$0xff] %v4159_v57  ;;  %v4165_v61 = vpop.f32.mrf.mxu3 }
  0xa8   : > { %v4162_v59 = vpop.f32.mrf.mxu1  ;;  %5203 = vst [vmem:[#allocation13_spill] sm:$0xff] %v4165_v61 }
  0xa9   : > { %v4167_v0 = vpop.f32.mrf.mxu0 }
  0xab   : > { %3552 = vmatmul.msk.bf16.gmra.mxu1 %vm302_vm1, %v539_v60  ;;  %3571 = vmatmul.msk.bf16.gmra.mxu2 %vm302_vm1, %v909_v10  ;;  %v1454_v10 = vrot.slane %v4180_v4, 1  ;;  %v918_v60 = vrot.slane %v3957_v9, 1 }
  0xac   : > { %3609 = vmatmul.msk.bf16.gmra.mxu0 %vm302_vm1, %v1453_v1  ;;  %3592 = vmatmul.msk.bf16.gmra.mxu3 %vm302_vm1, %v4171_v2 }
  0xad   : > { %v1456_v23 = vor.u32 %v1455_v20, %v1454_v10  ;;  %v553_v10 = vsel %vm501_vm3, %v549_v14, %v552_v24 }
  0xae   : > { %v4184_v5 = vpop.f32.mrf.mxu2 }
  0xaf   : > { %5206 = vst [vmem:[#allocation16_spill] sm:$0xff] %v4184_v5  ;;  %v4188_v7 = vpop.f32.mrf.mxu3  ;;  %v1457_v35 = vsel %vm1430_vm4, %v1452_v56, %v1456_v23 }
  0xb0   : > { %v4186_v6 = vpop.f32.mrf.mxu1  ;;  %5207 = vst [vmem:[#allocation17_spill] sm:$0xff] %v4188_v7 }
  0xb1   : > { %v4190_v16 = vpop.f32.mrf.mxu0 }
  0xb6   : > { %v4196_v26 = vpop.f32.mrf.mxu2 }
  0xb7   : > { %5208 = vst [vmem:[#allocation18_spill] sm:$0xff] %v4196_v26  ;;  %v4202_v33 = vpop.f32.mrf.mxu3  ;;  %v922_v26 = vrot.slane %v4001_v19, 1 }
  0xb8   : > { %v4199_v27 = vpop.f32.mrf.mxu1  ;;  %5209 = vst [vmem:[#allocation19_spill] sm:$0xff] %v4202_v33  ;;  %v920_v33 = vrot.slane %v3981_v15, 1 }
  0xb9   : > { %v4204_v34 = vpop.f32.mrf.mxu0 }
  0xba   : > { %v4310_v47 = vsel %vm898_vm2, %v920_v33, %v922_v26 }
  0xbb   : > { %3553 = vmatmul.msk.bf16.gmra.mxu1 %vm302_vm1, %v546_v29  ;;  %3572 = vmatmul.msk.bf16.gmra.mxu2 %vm302_vm1, %v4109_v30  ;;  %v1458_v30 = vrot.slane %v4218_v40, 1 }
  0xbc   : > { %3610 = vmatmul.msk.bf16.gmra.mxu0 %vm302_vm1, %v1457_v35  ;;  %3593 = vmatmul.msk.bf16.gmra.mxu3 %vm302_vm1, %v4208_v36  ;;  %v4246_v35 = vsel %vm898_vm2, %v916_v28, %v918_v60 }
  0xbd   : > { %v1460_v56 = vor.u32 %v1459_v55, %v1458_v30  ;;  %v4256_v30 = vshrl.u32 %v4049_v37, 16 }
  0xbe   : > { %v4222_v42 = vpop.f32.mrf.mxu2 }
  0xbf   : > { %5212 = vst [vmem:[#allocation22_spill] sm:$0xff] %v4222_v42  ;;  %v4226_v53 = vpop.f32.mrf.mxu3  ;;  %v1461_v29 = vsel %vm1430_vm4, %v1456_v23, %v1460_v56  ;;  %v4280_v42 = vsel %vm898_vm2, %v918_v60, %v920_v33 }
  0xc0   : > { %v4224_v43 = vpop.f32.mrf.mxu1  ;;  %5213 = vst [vmem:[#allocation23_spill] sm:$0xff] %v4226_v53 }
  0xc1   : > { %v4228_v54 = vpop.f32.mrf.mxu0 }
  0xc6   : > { %v4234_v58 = vpop.f32.mrf.mxu2 }
  0xc7   : > { %5214 = vst [vmem:[#allocation24_spill] sm:$0xff] %v4234_v58  ;;  %v4240_v20 = vpop.f32.mrf.mxu3 }
  0xc8   : > { %v4237_v1 = vpop.f32.mrf.mxu1  ;;  %5215 = vst [vmem:[#allocation25_spill] sm:$0xff] %v4240_v20  ;;  %v559_v20 = vrot.slane %v4215_v39, 1 }
  0xc9   : > { %v4242_v22 = vpop.f32.mrf.mxu0 }
  0xcb   : > { %3554 = vmatmul.msk.bf16.gmra.mxu1 %vm302_vm1, %v553_v10  ;;  %3573 = vmatmul.msk.bf16.gmra.mxu2 %vm302_vm1, %v4134_v46  ;;  %v1462_v46 = vrot.slane %v4256_v30, 1  ;;  %v1463_v10 = vrot.slane %v4253_v18, 2 }
  0xcc   : > { %3611 = vmatmul.msk.bf16.gmra.mxu0 %vm302_vm1, %v1461_v29  ;;  %3594 = vmatmul.msk.bf16.gmra.mxu3 %vm302_vm1, %v4246_v35  ;;  %v556_v29 = vor.u32 %v4180_v4, %v552_v24  ;;  %v4287_v24 = vshll.u32 %v3957_v9, 16 }
  0xcd   : > { %v1464_v37 = vor.u32 %v1463_v10, %v1462_v46  ;;  %v4290_v46 = vshrl.u32 %v3957_v9, 16 }
  0xce   : > { %v4260_v23 = vpop.f32.mrf.mxu2  ;;  %v560_v61 = vsel %vm501_vm3, %v556_v29, %v559_v20  ;;  %v563_v29 = vor.u32 %v4218_v40, %v559_v20 }
  0xcf   : > { %5217 = vst [vmem:[#allocation27_spill] sm:$0xff] %v4260_v23  ;;  %v1230_v55 = vpop.f32.mrf.mxu3  ;;  %v1465_v58 = vsel %vm1430_vm4, %v1460_v56, %v1464_v37 }
  0xd0   : > { %v4262_v28 = vpop.f32.mrf.mxu1 }
  0xd1   : > { %v4264_v14 = vpop.f32.mrf.mxu0 }
  0xd6   : > { %v4270_v53 = vpop.f32.mrf.mxu2 }
  0xd7   : > { %5218 = vst [vmem:[#allocation28_spill] sm:$0xff] %v4270_v53  ;;  %v1232_v51 = vpop.f32.mrf.mxu3  ;;  %v566_v53 = vrot.slane %v4253_v18, 1 }
  0xd8   : > { %v4273_v7 = vpop.f32.mrf.mxu1 }
  0xd9   : > { %v4276_v23 = vpop.f32.mrf.mxu0  ;;  %v570_v18 = vor.u32 %v4256_v30, %v566_v53 }
  0xdb   : > { %3555 = vmatmul.msk.bf16.gmra.mxu1 %vm302_vm1, %v560_v61  ;;  %3574 = vmatmul.msk.bf16.gmra.mxu2 %vm302_vm1, %v4171_v2  ;;  %v1466_v2 = vrot.slane %v4290_v46, 1 }
  0xdc   : > { %3612 = vmatmul.msk.bf16.gmra.mxu0 %vm302_vm1, %v1465_v58  ;;  %3595 = vmatmul.msk.bf16.gmra.mxu3 %vm302_vm1, %v4280_v42  ;;  %v1467_v58 = vrot.slane %v4287_v24, 2 }
  0xde   : > { %v4294_v56 = vpop.f32.mrf.mxu2  ;;  %v1468_v9 = vor.u32 %v1467_v58, %v1466_v2  ;;  %v4318_v2 = vshll.u32 %v3981_v15, 16  ;;  %v4321_v58 = vshrl.u32 %v3981_v15, 16  ;;  %v573_v15 = vrot.slane %v4287_v24, 1 }
  0xdf   : > { %5219 = vst [vmem:[#allocation29_spill] sm:$0xff] %v4294_v56  ;;  %v1235_v10 = vpop.f32.mrf.mxu3  ;;  %v567_v56 = vsel %vm501_vm3, %v563_v29, %v566_v53 }
  0xe0   : > { %v4296_v60 = vpop.f32.mrf.mxu1  ;;  %v1469_v57 = vsel %vm1430_vm4, %v1464_v37, %v1468_v9 }
  0xe1   : > { %5220 = vst [vmem:[#allocation30_spill] sm:$0xff] %v4296_v60  ;;  %v4298_v61 = vpop.f32.mrf.mxu0 }
  0xe6   : > { %v4304_v39 = vpop.f32.mrf.mxu2 }
  0xe7   : > { %5221 = vst [vmem:[#allocation31_spill] sm:$0xff] %v4304_v39  ;;  %v1237_v4 = vpop.f32.mrf.mxu3 }
  0xe8   : > { %v698_v3 = vpop.f32.mrf.mxu1 }
  0xe9   : > { %v1582_v5 = vpop.f32.mrf.mxu0  ;;  %v824_v20 = vadd.f32 %v698_v3, %v4130_v8  ;;  %v1471_v8 = vrot.slane %v4318_v2, 2 }
  0xeb   : > { %3556 = vmatmul.msk.bf16.gmra.mxu1 %vm302_vm1, %v567_v56  ;;  %3575 = vmatmul.msk.bf16.gmra.mxu2 %vm302_vm1, %v4208_v36 }
  0xec   : > { %3613 = vmatmul.msk.bf16.gmra.mxu0 %vm302_vm1, %v1469_v57  ;;  %3596 = vmatmul.msk.bf16.gmra.mxu3 %vm302_vm1, %v4310_v47  ;;  %v1470_v57 = vrot.slane %v4321_v58, 1 }
  0xee   : > { %v1002_v33 = vpop.f32.mrf.mxu2  ;;  %v1472_v48 = vor.u32 %v1471_v8, %v1470_v57 }
  0xef   : > { %v1128_v37 = vadd.f32 %v1002_v33, %v824_v20  ;;  %v4325_v56 = vpop.f32.mrf.mxu3  ;;  %v924_v20 = vrot.slane %v4019_v25, 1 }
  0xf0   : > { %v700_v29 = vpop.f32.mrf.mxu1 }
  0xf1   : > { %v1356_v39 = vadd.f32 %v1230_v55, %v1128_v37  ;;  %v1584_v36 = vpop.f32.mrf.mxu0  ;;  %v825_v40 = vadd.f32 %v700_v29, %v4153_v52  ;;  %v574_v55 = vsel %vm501_vm3, %v570_v18, %v573_v15 }
  0xf3   : > { %v4329_v3 = vadd.f32 %v1582_v5, %v1356_v39  ;;  %v1473_v5 = vsel %vm1430_vm4, %v1468_v9, %v1472_v48  ;;  %v4340_v39 = vsel %vm898_vm2, %v922_v26, %v924_v20 }
  0xf6   : > { %v1004_v49 = vpop.f32.mrf.mxu2 }
  0xf7   : > { %v1129_v33 = vadd.f32 %v1004_v49, %v825_v40  ;;  %v4336_v37 = vpop.f32.mrf.mxu3  ;;  %v4350_v40 = vshll.u32 %v4001_v19, 16 }
  0xf8   : > { %v703_v60 = vpop.f32.mrf.mxu1 }
  0xf9   : > { %v1357_v31 = vadd.f32 %v1232_v51, %v1129_v33  ;;  %v1587_v32 = vpop.f32.mrf.mxu0  ;;  %v826_v49 = vadd.f32 %v703_v60, %v4167_v0  ;;  %v4353_v51 = vshrl.u32 %v4001_v19, 16  ;;  %v1475_v0 = vrot.slane %v4350_v40, 2 }
  0xfa   : > { %v580_v19 = vrot.slane %v4318_v2, 1 }
  0xfb   : > { %3557 = vmatmul.msk.bf16.gmra.mxu1 %vm302_vm1, %v574_v55  ;;  %3576 = vmatmul.msk.bf16.gmra.mxu2 %vm302_vm1, %v4246_v35  ;;  %v4345_v52 = vadd.f32 %v1584_v36, %v1357_v31  ;;  %v1474_v29 = vrot.slane %v4353_v51, 1  ;;  %v577_v36 = vor.u32 %v4290_v46, %v573_v15  ;;  %v926_v55 = vrot.slane %v4052_v38, 1 }
  0xfc   : > { %3614 = vmatmul.msk.bf16.gmra.mxu0 %vm302_vm1, %v1473_v5  ;;  %3597 = vmatmul.msk.bf16.gmra.mxu3 %vm302_vm1, %v4340_v39 }
  0xfd   : > { %5222 = vst [vmem:[#allocation32_spill] sm:$0xff] %v4345_v52  ;;  %v1476_v8 = vor.u32 %v1475_v0, %v1474_v29  ;;  %v4372_v15 = vsel %vm898_vm2, %v924_v20, %v926_v55 }
  0xfe   : > { %v1007_v26 = vpop.f32.mrf.mxu2 }
  0xff   : > { %v1130_v53 = vadd.f32 %v1007_v26, %v826_v49  ;;  %v4357_v9 = vpop.f32.mrf.mxu3 }
 0x100   : > { %v705_v18 = vpop.f32.mrf.mxu1 }
 0x101   : > { %v1358_v31 = vadd.f32 %v1235_v10, %v1130_v53  ;;  %v1589_v35 = vpop.f32.mrf.mxu0  ;;  %v827_v57 = vadd.f32 %v705_v18, %v4190_v16  ;;  %v581_v10 = vsel %vm501_vm3, %v577_v36, %v580_v19 }
 0x103   : > { %v4361_v60 = vadd.f32 %v1587_v32, %v1358_v31  ;;  %v1477_v32 = vsel %vm1430_vm4, %v1472_v48, %v1476_v8  ;;  %v4382_v31 = vshll.u32 %v4019_v25, 16 }
 0x106   : > { %v1009_v33 = vpop.f32.mrf.mxu2 }
 0x107   : > { %v1131_v5 = vadd.f32 %v1009_v33, %v827_v57  ;;  %v4368_v26 = vpop.f32.mrf.mxu3  ;;  %v587_v33 = vrot.slane %v4350_v40, 1 }
 0x108   : > { %v708_v49 = vpop.f32.mrf.mxu1 }
 0x109   : > { %v1359_v53 = vadd.f32 %v1237_v4, %v1131_v5  ;;  %v1592_v52 = vpop.f32.mrf.mxu0  ;;  %v828_v18 = vadd.f32 %v708_v49, %v4204_v34  ;;  %v4385_v4 = vshrl.u32 %v4019_v25, 16  ;;  %v1479_v34 = vrot.slane %v4382_v31, 2 }
 0x10a   : > { %v584_v25 = vor.u32 %v4321_v58, %v580_v19 }
 0x10b   : > { %3558 = vmatmul.msk.bf16.gmra.mxu1 %vm302_vm1, %v581_v10  ;;  %3577 = vmatmul.msk.bf16.gmra.mxu2 %vm302_vm1, %v4280_v42  ;;  %v4377_v16 = vadd.f32 %v1589_v35, %v1359_v53  ;;  %v1478_v36 = vrot.slane %v4385_v4, 1  ;;  %v928_v53 = vrot.slane %v3967_v11, 1 }
 0x10c   : > { %3615 = vmatmul.msk.bf16.gmra.mxu0 %vm302_vm1, %v1477_v32  ;;  %3598 = vmatmul.msk.bf16.gmra.mxu3 %vm302_vm1, %v4372_v15 }
 0x10d   : > { %v1480_v49 = vor.u32 %v1479_v34, %v1478_v36  ;;  %v4406_v19 = vsel %vm898_vm2, %v926_v55, %v928_v53  ;;  %v4416_v36 = vshll.u32 %v4052_v38, 16 }
 0x10e   : > { %v1012_v48 = vpop.f32.mrf.mxu2 }
 0x10f   : > { %v1132_v20 = vadd.f32 %v1012_v48, %v828_v18  ;;  %v4389_v0 = vpop.f32.mrf.mxu3 }
 0x110   : > { %v710_v29 = vpop.f32.mrf.mxu1 }
 0x111   : > { %v1360_v42 = vadd.f32 %v4325_v56, %v1132_v20  ;;  %v1594_v35 = vpop.f32.mrf.mxu0  ;;  %v829_v5 = vadd.f32 %v710_v29, %v4228_v54  ;;  %v588_v56 = vsel %vm501_vm3, %v584_v25, %v587_v33 }
 0x113   : > { %v4394_v57 = vadd.f32 %v1592_v52, %v1360_v42  ;;  %v1481_v42 = vsel %vm1430_vm4, %v1476_v8, %v1480_v49 }
 0x116   : > { %v1014_v10 = vpop.f32.mrf.mxu2 }
 0x117   : > { %v1133_v32 = vadd.f32 %v1014_v10, %v829_v5  ;;  %v4401_v48 = vpop.f32.mrf.mxu3 }
 0x118   : > { %v713_v18 = vpop.f32.mrf.mxu1 }
 0x119   : > { %v1361_v20 = vadd.f32 %v4336_v37, %v1133_v32  ;;  %v1597_v52 = vpop.f32.mrf.mxu0  ;;  %v830_v29 = vadd.f32 %v713_v18, %v4242_v22  ;;  %v4419_v37 = vshrl.u32 %v4052_v38, 16  ;;  %v1483_v22 = vrot.slane %v4416_v36, 2 }
 0x11a   : > { %v591_v38 = vor.u32 %v4353_v51, %v587_v33  ;;  %v594_v32 = vrot.slane %v4382_v31, 1 }
 0x11b   : > { %3559 = vmatmul.msk.bf16.gmra.mxu1 %vm302_vm1, %v588_v56  ;;  %3578 = vmatmul.msk.bf16.gmra.mxu2 %vm302_vm1, %v4310_v47  ;;  %v4411_v54 = vadd.f32 %v1594_v35, %v1361_v20  ;;  %v1482_v5 = vrot.slane %v4419_v37, 1 }
 0x11c   : > { %3616 = vmatmul.msk.bf16.gmra.mxu0 %vm302_vm1, %v1481_v42  ;;  %3599 = vmatmul.msk.bf16.gmra.mxu3 %vm302_vm1, %v4406_v19  ;;  %v930_v42 = vrot.slane %v3987_v17, 1 }
 0x11d   : > { %5223 = vst [vmem:[#allocation33_spill] sm:$0xff] %v4411_v54  ;;  %v1484_v56 = vor.u32 %v1483_v22, %v1482_v5  ;;  %v4450_v5 = vshll.u32 %v3967_v11, 16 }
 0x11e   : > { %v1017_v8 = vpop.f32.mrf.mxu2  ;;  %v4440_v33 = vsel %vm898_vm2, %v928_v53, %v930_v42 }
 0x11f   : > { %v1134_v55 = vadd.f32 %v1017_v8, %v830_v29  ;;  %v4423_v25 = vpop.f32.mrf.mxu3 }
 0x120   : > { %v715_v34 = vpop.f32.mrf.mxu1 }
 0x121   : > { %v1362_v47 = vadd.f32 %v4357_v9, %v1134_v55  ;;  %v1599_v35 = vpop.f32.mrf.mxu0  ;;  %v831_v18 = vadd.f32 %v715_v34, %v4264_v14  ;;  %v595_v9 = vsel %vm501_vm3, %v591_v38, %v594_v32 }
 0x123   : > { %v4428_v10 = vadd.f32 %v1597_v52, %v1362_v47  ;;  %v1485_v47 = vsel %vm1430_vm4, %v1480_v49, %v1484_v56 }
 0x126   : > { %v1019_v20 = vpop.f32.mrf.mxu2 }
 0x127   : > { %v1135_v29 = vadd.f32 %v1019_v20, %v831_v18  ;;  %v4435_v55 = vpop.f32.mrf.mxu3  ;;  %v601_v20 = vrot.slane %v4416_v36, 1 }
 0x128   : > { %v718_v8 = vpop.f32.mrf.mxu1 }
 0x129   : > { %v1363_v54 = vadd.f32 %v4368_v26, %v1135_v29  ;;  %v1602_v52 = vpop.f32.mrf.mxu0  ;;  %v832_v34 = vadd.f32 %v718_v8, %v4276_v23  ;;  %v4453_v26 = vshrl.u32 %v3967_v11, 16  ;;  %v1487_v23 = vrot.slane %v4450_v5, 2 }
 0x12a   : > { %v598_v11 = vor.u32 %v4385_v4, %v594_v32 }
 0x12b   : > { %3560 = vmatmul.msk.bf16.gmra.mxu1 %vm302_vm1, %v595_v9  ;;  %3579 = vmatmul.msk.bf16.gmra.mxu2 %vm302_vm1, %v4340_v39  ;;  %v4445_v14 = vadd.f32 %v1599_v35, %v1363_v54  ;;  %v1486_v35 = vrot.slane %v4453_v26, 1 }
 0x12c   : > { %3617 = vmatmul.msk.bf16.gmra.mxu0 %vm302_vm1, %v1485_v47  ;;  %3600 = vmatmul.msk.bf16.gmra.mxu3 %vm302_vm1, %v4440_v33  ;;  %v4468_v47 = vrot.slane %v4005_v21, 1 }
 0x12d   : > { %5224 = vst [vmem:[#allocation34_spill] sm:$0xff] %v4445_v14  ;;  %v1488_v8 = vor.u32 %v1487_v23, %v1486_v35 }
 0x12e   : > { %v1022_v49 = vpop.f32.mrf.mxu2 }
 0x12f   : > { %v1136_v53 = vadd.f32 %v1022_v49, %v832_v34  ;;  %v4457_v38 = vpop.f32.mrf.mxu3  ;;  %v602_v49 = vsel %vm501_vm3, %v598_v11, %v601_v20  ;;  %v1489_v32 = vsel %vm1430_vm4, %v1484_v56, %v1488_v8  ;;  %v4490_v56 = vshrl.u32 %v3987_v17, 16 }
 0x130   : > { %v720_v22 = vpop.f32.mrf.mxu1 }
 0x131   : > { %v1364_v39 = vadd.f32 %v4389_v0, %v1136_v53  ;;  %v1604_v54 = vpop.f32.mrf.mxu0  ;;  %v833_v29 = vadd.f32 %v720_v22, %v4298_v61 }
 0x133   : > { %v4462_v18 = vadd.f32 %v1602_v52, %v1364_v39 }
 0x135   : > { %5225 = vst [vmem:[#allocation35_spill] sm:$0xff] %v4462_v18  ;;  %v4477_v18 = vsel %vm898_vm2, %v930_v42, %v4468_v47 }
 0x136   : > { %v1024_v9 = vpop.f32.mrf.mxu2 }
 0x137   : > { %v1137_v34 = vadd.f32 %v1024_v9, %v833_v29  ;;  %v4471_v53 = vpop.f32.mrf.mxu3  ;;  %v1490_v29 = vrot.slane %v4490_v56, 1  ;;  %v4500_v9 = vld [vmem:[%s3951_s9 + $0x90] sm:$0xff]  }
 0x138   : > { %v723_v0 = vpop.f32.mrf.mxu1 }
 0x139   : > { %v1365_v52 = vadd.f32 %v4401_v48, %v1137_v34  ;;  %v1607_v39 = vpop.f32.mrf.mxu0  ;;  %v834_v22 = vadd.f32 %v723_v0, %v4127_v41  ;;  %v4487_v48 = vshll.u32 %v3987_v17, 16  ;;  %v605_v17 = vor.u32 %v4419_v37, %v601_v20 }
 0x13a   : > { %v608_v0 = vrot.slane %v4450_v5, 1 }
 0x13b   : > { %3561 = vmatmul.msk.bf16.gmra.mxu1 %vm302_vm1, %v602_v49  ;;  %3580 = vmatmul.msk.bf16.gmra.mxu2 %vm302_vm1, %v4372_v15  ;;  %v4482_v61 = vadd.f32 %v1604_v54, %v1365_v52  ;;  %v1491_v41 = vrot.slane %v4487_v48, 2 }
 0x13c   : > { %3618 = vmatmul.msk.bf16.gmra.mxu0 %vm302_vm1, %v1489_v32  ;;  %3601 = vmatmul.msk.bf16.gmra.mxu3 %vm302_vm1, %v4477_v18 }
 0x13d   : > { %5226 = vst [vmem:[#allocation36_spill] sm:$0xff] %v4482_v61  ;;  %v1492_v52 = vor.u32 %v1491_v41, %v1490_v29  ;;  %v4523_v29 = vshll.u32 %v4005_v21, 16 }
 0x13e   : > { %v1027_v42 = vpop.f32.mrf.mxu2 }
 0x13f   : > { %v1138_v35 = vadd.f32 %v1027_v42, %v834_v22  ;;  %v4494_v11 = vpop.f32.mrf.mxu3  ;;  %v1208_v22 = vrot.slane %v4500_v9, 1  ;;  %v1493_v20 = vsel %vm1430_vm4, %v1488_v8, %v1492_v52  ;;  %v3730_v8 = vld [vmem:[%s3951_s9 + $0x98] sm:$0xff]  }
 0x140   : > { %v725_v23 = vpop.f32.mrf.mxu1 }
 0x141   : > { %v1366_v15 = vadd.f32 %v4423_v25, %v1138_v35  ;;  %v1609_v54 = vpop.f32.mrf.mxu0  ;;  %v835_v49 = vadd.f32 %v725_v23, %v4149_v50  ;;  %v609_v35 = vsel %vm501_vm3, %v605_v17, %v608_v0  ;;  %v3727_v17 = vunpack.c.l.b16 %v3730_v8 }
 0x143   : > { %v4502_v34 = vadd.f32 %v1607_v39, %v1366_v15 }
 0x145   : > { %5227 = vst [vmem:[#allocation37_spill] sm:$0xff] %v4502_v34  ;;  %v1209_v34 = vsel %vm898_vm2, %v4468_v47, %v1208_v22 }
 0x146   : > { %v1029_v32 = vpop.f32.mrf.mxu2 }
 0x147   : > { %v1139_v25 = vadd.f32 %v1029_v32, %v835_v49  ;;  %v4509_v61 = vpop.f32.mrf.mxu3 }
 0x148   : > { %v728_v42 = vpop.f32.mrf.mxu1 }
 0x149   : > { %v1367_v39 = vadd.f32 %v4435_v55, %v1139_v25  ;;  %v1612_v15 = vpop.f32.mrf.mxu0  ;;  %v836_v23 = vadd.f32 %v728_v42, %v4162_v59  ;;  %v4526_v55 = vshrl.u32 %v4005_v21, 16  ;;  %v1495_v42 = vrot.slane %v4523_v29, 2 }
 0x14b   : > { %3562 = vmatmul.msk.bf16.gmra.mxu1 %vm302_vm1, %v609_v35  ;;  %3581 = vmatmul.msk.bf16.gmra.mxu2 %vm302_vm1, %v4406_v19  ;;  %v4518_v50 = vadd.f32 %v1609_v54, %v1367_v39  ;;  %v1494_v59 = vrot.slane %v4526_v55, 1  ;;  %v4535_v35 = vpack.c.b16 %v3727_v17, %v3727_v17  ;;  %v615_v39 = vrot.slane %v4487_v48, 1 }
 0x14c   : > { %3619 = vmatmul.msk.bf16.gmra.mxu0 %vm302_vm1, %v1493_v20  ;;  %3602 = vmatmul.msk.bf16.gmra.mxu3 %vm302_vm1, %v1209_v34  ;;  %v612_v34 = vor.u32 %v4453_v26, %v608_v0 }
 0x14d   : > { %5228 = vst [vmem:[#allocation38_spill] sm:$0xff] %v4518_v50 }
 0x14e   : > { %v1032_v41 = vpop.f32.mrf.mxu2  ;;  %v616_v50 = vsel %vm501_vm3, %v612_v34, %v615_v39 }
 0x14f   : > { %v1140_v49 = vadd.f32 %v1032_v41, %v836_v23  ;;  %v4530_v19 = vpop.f32.mrf.mxu3  ;;  %v1496_v23 = vor.u32 %v1495_v42, %v1494_v59  ;;  %v1210_v41 = vrot.slane %v4535_v35, 1  ;;  %v5193_v59 = vshrl.u32 %v4500_v9, 16 }
 0x150   : > { %v730_v32 = vpop.f32.mrf.mxu1 }
 0x151   : > { %v1368_v54 = vadd.f32 %v4457_v38, %v1140_v49  ;;  %v1614_v25 = vpop.f32.mrf.mxu0  ;;  %v837_v20 = vadd.f32 %v730_v32, %v4186_v6  ;;  %v1211_v0 = vsel %vm898_vm2, %v1208_v22, %v1210_v41  ;;  %v2318_v41 = vrot.slane %v4082_v63, 2 }
 0x152   : > { %v3723_v63 = vunpack.c.l.b16 %v4500_v9 }
 0x153   : > { %v4537_v21 = vadd.f32 %v1612_v15, %v1368_v54  ;;  %v1497_v54 = vsel %vm1430_vm4, %v1492_v52, %v1496_v23 }
 0x156   : > { %v1034_v8 = vpop.f32.mrf.mxu2 }
 0x157   : > { %v1141_v38 = vadd.f32 %v1034_v8, %v837_v20  ;;  %v4544_v14 = vpop.f32.mrf.mxu3  ;;  %v2315_v20 = vrot.slane %v4066_v45, 2  ;;  %v2316_v8 = vrot.slane %v4064_v44, 3 }
 0x158   : > { %v733_v49 = vpop.f32.mrf.mxu1 }
 0x159   : > { %v1369_v17 = vadd.f32 %v4471_v53, %v1141_v38  ;;  %v1617_v15 = vpop.f32.mrf.mxu0  ;;  %v838_v32 = vadd.f32 %v733_v49, %v4199_v27  ;;  %v5192_v53 = vshll.u32 %v4500_v9, 16  ;;  %v2319_v38 = vrot.slane %v4080_v62, 3 }
 0x15b   : > { %3563 = vmatmul.msk.bf16.gmra.mxu1 %vm302_vm1, %v616_v50  ;;  %3582 = vmatmul.msk.bf16.gmra.mxu2 %vm302_vm1, %v4440_v33  ;;  %v4552_v6 = vadd.f32 %v1614_v25, %v1369_v17  ;;  %v1501_v25 = vrot.slane %v5193_v59, 1  ;;  %v1504_v27 = vrot.slane %v5192_v53, 2  ;;  %v619_v17 = vor.u32 %v4490_v56, %v615_v39 }
 0x15c   : > { %3620 = vmatmul.msk.bf16.gmra.mxu0 %vm302_vm1, %v1497_v54  ;;  %3603 = vmatmul.msk.bf16.gmra.mxu3 %vm302_vm1, %v1211_v0 }
 0x15d   : > { %v1505_v0 = vor.u32 %v1504_v27, %v1501_v25  ;;  %v500_v25 = vpack.c.b16 %v3723_v63, %v3723_v63 }
 0x15e   : > { %v1037_v52 = vpop.f32.mrf.mxu2 }
 0x15f   : > { %v1142_v42 = vadd.f32 %v1037_v52, %v838_v32  ;;  %v4559_v34 = vpop.f32.mrf.mxu3  ;;  %v2317_v52 = vor.u32 %v2316_v8, %v2315_v20  ;;  %v1508_v20 = vshrl.u32 %v4535_v35, 16  ;;  %v934_v63 = vrot.slane %v500_v25, 1 }
 0x160   : > { %v735_v22 = vpop.f32.mrf.mxu1 }
 0x161   : > { %v1370_v50 = vadd.f32 %v4494_v11, %v1142_v42  ;;  %v1619_v33 = vpop.f32.mrf.mxu0  ;;  %v622_v11 = vrot.slane %v4523_v29, 1  ;;  %v839_v54 = vadd.f32 %v735_v22, %v4224_v43  ;;  %v2320_v42 = vor.u32 %v2319_v38, %v2318_v41 }
 0x162   : > { %v628_v41 = vshll.u32 %v500_v25, 16 }
 0x163   : > { %v4570_v49 = vadd.f32 %v1617_v15, %v1370_v50  ;;  %v623_v44 = vsel %vm501_vm3, %v619_v17, %v622_v11  ;;  %v1506_v50 = vsel %vm1430_vm4, %v1496_v23, %v1505_v0  ;;  %v2321_v43 = vsel %vm2314_vm5, %v2317_v52, %v2320_v42 }
 0x164   : > { %v1510_v17 = vrot.slane %v1508_v20, 1 }
 0x166   : > { %v1039_v32 = vpop.f32.mrf.mxu2 }
 0x167   : > { %v1143_v53 = vadd.f32 %v1039_v32, %v839_v54  ;;  %v4577_v62 = vpop.f32.mrf.mxu3  ;;  %v2322_v32 = vrot.slane %v4098_v13, 2  ;;  %v935_v13 = vsel %vm898_vm2, %v4468_v47, %v934_v63  ;;  %v3779_v63 = vld [vmem:[%s3951_s9 + $0x10] sm:$0xff] }
 0x168   : > { %v738_v45 = vpop.f32.mrf.mxu1 }
 0x169   : > { %v1371_v15 = vadd.f32 %v4509_v61, %v1143_v53  ;;  %v1622_v39 = vpop.f32.mrf.mxu0  ;;  %v840_v27 = vadd.f32 %v738_v45, %v4237_v1  ;;  %v1511_v61 = vshll.u32 %v4535_v35, 16  ;;  %v2323_v1 = vrot.slane %v4096_v12, 3 }
 0x16a   : > { %v626_v45 = vor.u32 %v4526_v55, %v622_v11 }
 0x16b   : > { %3564 = vmatmul.msk.bf16.gmra.mxu1 %vm302_vm1, %v623_v44  ;;  %3583 = vmatmul.msk.bf16.gmra.mxu2 %vm302_vm1, %v4477_v18  ;;  %v4585_v22 = vadd.f32 %v1619_v33, %v1371_v15  ;;  %v1513_v54 = vrot.slane %v1511_v61, 2  ;;  %v630_v44 = vrot.slane %v628_v41, 1 }
 0x16c   : > { %3621 = vmatmul.msk.bf16.gmra.mxu0 %vm302_vm1, %v1506_v50  ;;  %3662 = vmatmul.msk.bf16.vlgmr.msra.gmra.mxu3 %vm302_vm1, %v2321_v43 }
 0x16d   : > { %v1514_v50 = vor.u32 %v1513_v54, %v1510_v17  ;;  %v631_v20 = vsel %vm501_vm3, %v626_v45, %v630_v44  ;;  %v5230_v54 = vld [vmem:[#allocation6_spill] sm:$0xff] }
 0x16e   : > { %v1042_v23 = vpop.f32.mrf.mxu2  ;;  %v3778_v45 = vld [vmem:[%s3951_s9 + $0x8] sm:$0xff] }
 0x16f   : > { %v1144_v53 = vadd.f32 %v1042_v23, %v840_v27  ;;  %v4592_v38 = vpop.f32.mrf.mxu3  ;;  %v2324_v27 = vor.u32 %v2323_v1, %v2322_v32  ;;  %v1515_v11 = vsel %vm1430_vm4, %v1505_v0, %v1514_v50  ;;  %v2327_v32 = vrot.slane %v5230_v54, 3 }
 0x170   : > { %v740_v8 = vpop.f32.mrf.mxu1  ;;  %v1783_v44 = vrot.slane %v3778_v45, 2 }
 0x171   : > { %v1372_v18 = vadd.f32 %v4530_v19, %v1144_v53  ;;  %v1624_v33 = vpop.f32.mrf.mxu0  ;;  %v841_v15 = vadd.f32 %v740_v8, %v4262_v28  ;;  %v2325_v25 = vsel %vm2314_vm5, %v2320_v42, %v2324_v27 }
 0x173   : > { %v4597_v52 = vadd.f32 %v1622_v39, %v1372_v18  ;;  %v3861_v18 = vmov 0  }
 0x174   : > { %3775 = vset.pattern.permute.xlu0 %v3861_v18  ;;  %3776 = vset.pattern.permute.xlu1 %v3861_v18 }
 0x175   : > { %3777 = vset.pattern.permute.xlu2 %v3861_v18 }
 0x176   : > { %v1044_v43 = vpop.f32.mrf.mxu2 }
 0x177   : > { %v1145_v23 = vadd.f32 %v1044_v43, %v841_v15  ;;  %v4604_v61 = vpop.f32.mrf.mxu3  ;;  %v3780_v15 = vld [vmem:[%s3951_s9 + $0x18] sm:$0xff]  ;;  %v5231_v43 = vld [vmem:[#allocation30_spill] sm:$0xff] }
 0x178   : > { %v743_v19 = vpop.f32.mrf.mxu1  ;;  %v1786_v50 = vrot.slane %v3780_v15, 2 }
 0x179   : > { %v1373_v12 = vadd.f32 %v4544_v14, %v1145_v23  ;;  %v1627_v39 = vpop.f32.mrf.mxu0  ;;  %v842_v53 = vadd.f32 %v743_v19, %v4273_v7  ;;  %v5229_v7 = vld [vmem:[#allocation7_spill] sm:$0xff]  ;;  %v2667_v19 = vrot.slane %v3779_v63, 3 }
 0x17a   : > { %v2326_v17 = vrot.slane %v5229_v7, 2 }
 0x17b   : > { %3565 = vmatmul.msk.bf16.gmra.mxu1 %vm302_vm1, %v631_v20  ;;  %3584 = vmatmul.msk.bf16.gmra.mxu2 %vm302_vm1, %v935_v13  ;;  %v4611_v28 = vadd.f32 %v1624_v33, %v1373_v12  ;;  %v3004_v33 = vld [vmem:[%s5181_s2] sm:$0xff]  ;;  %v2668_v20 = vrot.slane %v3780_v15, 3 }
 0x17c   : > { %3622 = vmatmul.msk.bf16.gmra.mxu0 %vm302_vm1, %v1515_v11  ;;  %3663 = vmatmul.msk.bf16.gmra.mxu3 %vm302_vm1, %v2325_v25  ;;  %v2328_v12 = vor.u32 %v2327_v32, %v2326_v17 }
 0x17d   : > { %3042 = vperm.xlu0 %3775, %v3004_v33   ;;  %v2669_v18 = vsel %vm2666_vm7, %v2667_v19, %v2668_v20 }
 0x17e   : > { %v1047_v47 = vpop.f32.mrf.mxu2  ;;  %v2329_v33 = vsel %vm2314_vm5, %v2324_v27, %v2328_v12 }
 0x17f   : > { %v1146_v14 = vadd.f32 %v1047_v47, %v842_v53  ;;  %v4616_v0 = vpop.f32.mrf.mxu3 }
 0x180   : > { %v745_v8 = vpop.f32.mrf.mxu1 }
 0x181   : > { %v1374_v42 = vadd.f32 %v4559_v34, %v1146_v14  ;;  %v1629_v41 = vpop.f32.mrf.mxu0  ;;  %v1784_v34 = vrot.slane %v3779_v63, 2  ;;  %v843_v23 = vadd.f32 %v745_v8, %v5231_v43  ;;  %v3005_v8 = vld [vmem:[%s5181_s2 + $0x8] sm:$0xff]  ;;  %v5234_v43 = vld [vmem:[#allocation8_spill] sm:$0xff] }
 0x183   : > { %v4624_v1 = vadd.f32 %v1627_v39, %v1374_v42  ;;  %v1785_v53 = vsel %vm1782_vm6, %v1783_v44, %v1784_v34  ;;  %v1787_v39 = vsel %vm1782_vm6, %v1784_v34, %v1786_v50  ;;  %v3006_v34 = vld [vmem:[%s5181_s2 + $0x10] sm:$0xff] }
 0x184   : > { %3052 = vperm.xlu1 %3776, %v3006_v34  }
 0x185   : > { %3047 = vperm.xlu0 %3775, %v3005_v8  }
 0x186   : > { %v1049_v13 = vpop.f32.mrf.mxu2 }
 0x187   : > { %v1147_v11 = vadd.f32 %v1049_v13, %v843_v23  ;;  %v4632_v47 = vpop.f32.mrf.mxu3  ;;  %v2331_v23 = vrot.slane %v5234_v43, 3  ;;  %v3781_v13 = vld [vmem:[%s3951_s9 + $0x20] sm:$0xff] }
 0x188   : > { %v748_v25 = vpop.f32.mrf.mxu1 }
 0x189   : > { %v1375_v14 = vadd.f32 %v4577_v62, %v1147_v11  ;;  %v1632_v42 = vpop.f32.mrf.mxu0  ;;  %v5232_v62 = vld [vmem:[#allocation10_spill] sm:$0xff]  ;;  %v1788_v11 = vrot.slane %v3781_v13, 2 }
 0x18a   : > { %v844_v17 = vadd.f32 %v748_v25, %v5232_v62  ;;  %v5235_v25 = vld [vmem:[#allocation12_spill] sm:$0xff] }
 0x18b   : > { %3624 = vmatmul.msk.bf16.vlgmr.msra.gmra.mxu1 %vm302_vm1, %v1785_v53  ;;  %3643 = vmatmul.msk.bf16.vlgmr.msra.gmra.mxu2 %vm302_vm1, %v1787_v39  ;;  %v4642_v7 = vadd.f32 %v1629_v41, %v1375_v14  ;;  %v5233_v41 = vld [vmem:[#allocation9_spill] sm:$0xff]  ;;  %v2670_v14 = vrot.slane %v3781_v13, 3  ;;  %v1789_v62 = vsel %vm1782_vm6, %v1786_v50, %v1788_v11  ;;  %v5237_v13 = vld [vmem:[#allocation15_spill] sm:$0xff] }
 0x18c   : > { %3681 = vmatmul.msk.bf16.vlgmr.msra.gmra.mxu0 %vm302_vm1, %v2669_v18  ;;  %3664 = vmatmul.msk.bf16.gmra.mxu3 %vm302_vm1, %v2329_v33  ;;  %v2330_v15 = vrot.slane %v5233_v41, 2 }
 0x18d   : > { %v2671_v34 = vsel %vm2666_vm7, %v2668_v20, %v2670_v14 }
 0x18e   : > { %v1052_v54 = vpop.f32.mrf.mxu2  ;;  %v2332_v8 = vor.u32 %v2331_v23, %v2330_v15 }
 0x18f   : > { %v1148_v32 = vadd.f32 %v1052_v54, %v844_v17  ;;  %v4647_v44 = vpop.f32.mrf.mxu3 }
 0x190   : > { %v750_v45 = vpop.f32.mrf.mxu1 }
 0x191   : > { %v1376_v27 = vadd.f32 %v4592_v38, %v1148_v32  ;;  %v1634_v63 = vpop.f32.mrf.mxu0  ;;  %v845_v53 = vadd.f32 %v750_v45, %v5235_v25  ;;  %v2333_v45 = vsel %vm2314_vm5, %v2328_v12, %v2332_v8  ;;  %v5238_v25 = vld [vmem:[#allocation14_spill] sm:$0xff] }
 0x193   : > { %v4655_v19 = vadd.f32 %v1632_v42, %v1376_v27  ;;  %v3007_v42 = vld [vmem:[%s5181_s2 + $0x18] sm:$0xff] }
 0x194   : > { %3057 = vperm.xlu1 %3776, %v3007_v42  }
 0x196   : > { %v1054_v18 = vpop.f32.mrf.mxu2 }
 0x197   : > { %v1149_v38 = vadd.f32 %v1054_v18, %v845_v53  ;;  %v4660_v17 = vpop.f32.mrf.mxu3  ;;  %v2335_v53 = vrot.slane %v5238_v25, 3  ;;  %v3782_v18 = vld [vmem:[%s3951_s9 + $0x28] sm:$0xff] }
 0x198   : > { %v753_v33 = vpop.f32.mrf.mxu1 }
 0x199   : > { %v1377_v54 = vadd.f32 %v4604_v61, %v1149_v38  ;;  %v1637_v32 = vpop.f32.mrf.mxu0  ;;  %v5236_v61 = vld [vmem:[#allocation16_spill] sm:$0xff]  ;;  %v1790_v38 = vrot.slane %v3782_v18, 2 }
 0x19a   : > { %v846_v27 = vadd.f32 %v753_v33, %v5236_v61 }
 0x19b   : > { %3625 = vmatmul.msk.bf16.gmra.mxu1 %vm302_vm1, %v1787_v39  ;;  %3644 = vmatmul.msk.bf16.gmra.mxu2 %vm302_vm1, %v1789_v62  ;;  %v4670_v50 = vadd.f32 %v1634_v63, %v1377_v54  ;;  %v2334_v39 = vrot.slane %v5237_v13, 2  ;;  %v5239_v54 = vld [vmem:[#allocation18_spill] sm:$0xff] }
 0x19c   : > { %3682 = vmatmul.msk.bf16.gmra.mxu0 %vm302_vm1, %v2671_v34  ;;  %3665 = vmatmul.msk.bf16.gmra.mxu3 %vm302_vm1, %v2333_v45  ;;  %v2672_v34 = vrot.slane %v3782_v18, 3 }
 0x19d   : > { %v2336_v45 = vor.u32 %v2335_v53, %v2334_v39 }
 0x19e   : > { %v1057_v20 = vpop.f32.mrf.mxu2  ;;  %v2673_v13 = vsel %vm2666_vm7, %v2670_v14, %v2672_v34 }
 0x19f   : > { %v1150_v41 = vadd.f32 %v1057_v20, %v846_v27  ;;  %v4675_v43 = vpop.f32.mrf.mxu3  ;;  %v1791_v20 = vsel %vm1782_vm6, %v1788_v11, %v1790_v38 }
 0x1a0   : > { %v755_v15 = vpop.f32.mrf.mxu1 }
 0x1a1   : > { %v1378_v12 = vadd.f32 %v4616_v0, %v1150_v41  ;;  %v1639_v23 = vpop.f32.mrf.mxu0  ;;  %v847_v33 = vadd.f32 %v755_v15, %v5239_v54  ;;  %v5243_v54 = vld [vmem:[#allocation20_spill] sm:$0xff] }
 0x1a3   : > { %v4680_v63 = vadd.f32 %v1637_v32, %v1378_v12  ;;  %v2337_v32 = vsel %vm2314_vm5, %v2332_v8, %v2336_v45  ;;  %v5241_v12 = vld [vmem:[#allocation22_spill] sm:$0xff] }
 0x1a6   : > { %v1059_v42 = vpop.f32.mrf.mxu2 }
 0x1a7   : > { %v1151_v61 = vadd.f32 %v1059_v42, %v847_v33  ;;  %v4685_v59 = vpop.f32.mrf.mxu3  ;;  %v2339_v33 = vrot.slane %v5243_v54, 3 }
 0x1a8   : > { %v758_v27 = vpop.f32.mrf.mxu1 }
 0x1a9   : > { %v1379_v0 = vadd.f32 %v4632_v47, %v1151_v61  ;;  %v1642_v41 = vpop.f32.mrf.mxu0  ;;  %v848_v11 = vadd.f32 %v758_v27, %v5241_v12  ;;  %v3783_v61 = vld [vmem:[%s3951_s9 + $0x30] sm:$0xff] }
 0x1aa   : > { %v1792_v27 = vrot.slane %v3783_v61, 2 }
 0x1ab   : > { %3626 = vmatmul.msk.bf16.gmra.mxu1 %vm302_vm1, %v1789_v62  ;;  %3645 = vmatmul.msk.bf16.gmra.mxu2 %vm302_vm1, %v1791_v20  ;;  %v4692_v15 = vadd.f32 %v1639_v23, %v1379_v0  ;;  %v3010_v62 = vld [vmem:[%s5181_s2 + $0x30] sm:$0xff]  ;;  %v5242_v23 = vld [vmem:[#allocation21_spill] sm:$0xff] }
 0x1ac   : > { %3683 = vmatmul.msk.bf16.gmra.mxu0 %vm302_vm1, %v2673_v13  ;;  %3666 = vmatmul.msk.bf16.gmra.mxu3 %vm302_vm1, %v2337_v32  ;;  %v2338_v18 = vrot.slane %v5242_v23, 2  ;;  %v5244_v0 = vld [vmem:[#allocation24_spill] sm:$0xff]  ;;  %v2674_v32 = vrot.slane %v3783_v61, 3 }
 0x1ad   : > { %5240 = vst [vmem:[#allocation7_spill] sm:$0xff] %v4692_v15  ;;  %3072 = vperm.xlu0 %3775, %v3010_v62  }
 0x1ae   : > { %v1062_v39 = vpop.f32.mrf.mxu2  ;;  %v2675_v54 = vsel %vm2666_vm7, %v2672_v34, %v2674_v32 }
 0x1af   : > { %v1152_v47 = vadd.f32 %v1062_v39, %v848_v11  ;;  %v4697_v53 = vpop.f32.mrf.mxu3  ;;  %v2340_v11 = vor.u32 %v2339_v33, %v2338_v18 }
 0x1b0   : > { %v760_v25 = vpop.f32.mrf.mxu1 }
 0x1b1   : > { %v1380_v14 = vadd.f32 %v4647_v44, %v1152_v47  ;;  %v1644_v8 = vpop.f32.mrf.mxu0  ;;  %v849_v13 = vadd.f32 %v760_v25, %v5244_v0  ;;  %v1793_v47 = vsel %vm1782_vm6, %v1790_v38, %v1792_v27  ;;  %v3011_v25 = vld [vmem:[%s5181_s2 + $0x38] sm:$0xff]  ;;  %v5246_v38 = vld [vmem:[#allocation27_spill] sm:$0xff] }
 0x1b2   : > { %3077 = vperm.xlu1 %3776, %v3011_v25  }
 0x1b3   : > { %v4705_v42 = vadd.f32 %v1642_v41, %v1380_v14  ;;  %v3008_v41 = vld [vmem:[%s5181_s2 + $0x20] sm:$0xff]  ;;  %v2341_v14 = vsel %vm2314_vm5, %v2336_v45, %v2340_v11 }
 0x1b4   : > { %3062 = vperm.xlu2 %3777, %v3008_v41   ;;  %v5248_v41 = vld [vmem:[#allocation28_spill] sm:$0xff] }
 0x1b6   : > { %v1064_v12 = vpop.f32.mrf.mxu2 }
 0x1b7   : > { %v1153_v44 = vadd.f32 %v1064_v12, %v849_v13  ;;  %v4710_v15 = vpop.f32.mrf.mxu3  ;;  %v5247_v12 = vld [vmem:[#allocation26_spill] sm:$0xff] }
 0x1b8   : > { %v763_v39 = vpop.f32.mrf.mxu1 }
 0x1b9   : > { %v1381_v62 = vadd.f32 %v4660_v17, %v1153_v44  ;;  %v1647_v23 = vpop.f32.mrf.mxu0  ;;  %v850_v34 = vadd.f32 %v763_v39, %v5246_v38  ;;  %v2343_v44 = vrot.slane %v5247_v12, 3 }
 0x1bb   : > { %3627 = vmatmul.msk.bf16.gmra.mxu1 %vm302_vm1, %v1791_v20  ;;  %3646 = vmatmul.msk.bf16.gmra.mxu2 %vm302_vm1, %v1793_v47  ;;  %v4723_v17 = vadd.f32 %v1644_v8, %v1381_v62  ;;  %v3009_v20 = vld [vmem:[%s5181_s2 + $0x28] sm:$0xff]  ;;  %v2342_v8 = vrot.slane %v4256_v30, 2  ;;  %v3784_v62 = vld [vmem:[%s3951_s9 + $0x38] sm:$0xff] }
 0x1bc   : > { %3684 = vmatmul.msk.bf16.gmra.mxu0 %vm302_vm1, %v2675_v54  ;;  %3667 = vmatmul.msk.bf16.gmra.mxu3 %vm302_vm1, %v2341_v14  ;;  %v1794_v54 = vrot.slane %v3784_v62, 2  ;;  %v2676_v14 = vrot.slane %v3784_v62, 3 }
 0x1bd   : > { %5245 = vst [vmem:[#allocation6_spill] sm:$0xff] %v4723_v17  ;;  %3067 = vperm.xlu2 %3777, %v3009_v20  }
 0x1be   : > { %v1067_v18 = vpop.f32.mrf.mxu2  ;;  %v2677_v12 = vsel %vm2666_vm7, %v2674_v32, %v2676_v14 }
 0x1bf   : > { %v1154_v33 = vadd.f32 %v1067_v18, %v850_v34  ;;  %v4728_v0 = vpop.f32.mrf.mxu3  ;;  %v2344_v34 = vor.u32 %v2343_v44, %v2342_v8 }
 0x1c0   : > { %v765_v61 = vpop.f32.mrf.mxu1 }
 0x1c1   : > { %v1382_v45 = vadd.f32 %v4675_v43, %v1154_v33  ;;  %v1649_v13 = vpop.f32.mrf.mxu0  ;;  %v851_v25 = vadd.f32 %v765_v61, %v5248_v41  ;;  %v1795_v33 = vsel %vm1782_vm6, %v1792_v27, %v1794_v54  ;;  %v2345_v61 = vsel %vm2314_vm5, %v2340_v11, %v2344_v34 }
 0x1c3   : > { %v4736_v39 = vadd.f32 %v1647_v23, %v1382_v45  ;;  %v3013_v23 = vld [vmem:[%s5181_s2 + $0x48] sm:$0xff] }
 0x1c4   : > { %3087 = vperm.xlu0 %3775, %v3013_v23  }
 0x1c6   : > { %v1069_v38 = vpop.f32.mrf.mxu2 }
 0x1c7   : > { %v1155_v43 = vadd.f32 %v1069_v38, %v851_v25  ;;  %v4741_v17 = vpop.f32.mrf.mxu3  ;;  %v2347_v25 = vrot.slane %v4287_v24, 3 }
 0x1c8   : > { %v768_v18 = vpop.f32.mrf.mxu1 }
 0x1c9   : > { %v1383_v20 = vadd.f32 %v4685_v59, %v1155_v43  ;;  %v1652_v30 = vpop.f32.mrf.mxu0  ;;  %v5249_v59 = vld [vmem:[#allocation29_spill] sm:$0xff] }
 0x1ca   : > { %v852_v45 = vadd.f32 %v768_v18, %v5249_v59  ;;  %v3785_v43 = vld [vmem:[%s3951_s9 + $0x40] sm:$0xff] }
 0x1cb   : > { %3628 = vmatmul.msk.bf16.gmra.mxu1 %vm302_vm1, %v1793_v47  ;;  %3647 = vmatmul.msk.bf16.gmra.mxu2 %vm302_vm1, %v1795_v33  ;;  %v4751_v27 = vadd.f32 %v1649_v13, %v1383_v20  ;;  %v3014_v47 = vld [vmem:[%s5181_s2 + $0x50] sm:$0xff]  ;;  %v2346_v13 = vrot.slane %v4290_v46, 2  ;;  %v1796_v18 = vrot.slane %v3785_v43, 2  ;;  %v2678_v23 = vrot.slane %v3785_v43, 3 }
 0x1cc   : > { %3685 = vmatmul.msk.bf16.gmra.mxu0 %vm302_vm1, %v2677_v12  ;;  %3668 = vmatmul.msk.bf16.gmra.mxu3 %vm302_vm1, %v2345_v61  ;;  %v5250_v20 = vld [vmem:[#allocation31_spill] sm:$0xff] }
 0x1cd   : > { %3092 = vperm.xlu1 %3776, %v3014_v47   ;;  %v2348_v59 = vor.u32 %v2347_v25, %v2346_v13  ;;  %v2679_v24 = vsel %vm2666_vm7, %v2676_v14, %v2678_v23 }
 0x1ce   : > { %v1072_v32 = vpop.f32.mrf.mxu2 }
 0x1cf   : > { %v1156_v8 = vadd.f32 %v1072_v32, %v852_v45  ;;  %v4756_v62 = vpop.f32.mrf.mxu3  ;;  %v1797_v32 = vsel %vm1782_vm6, %v1794_v54, %v1796_v18 }
 0x1d0   : > { %v770_v44 = vpop.f32.mrf.mxu1 }
 0x1d1   : > { %v1384_v11 = vadd.f32 %v4697_v53, %v1156_v8  ;;  %v1654_v41 = vpop.f32.mrf.mxu0  ;;  %v853_v12 = vadd.f32 %v770_v44, %v5250_v20  ;;  %v2349_v44 = vsel %vm2314_vm5, %v2344_v34, %v2348_v59 }
 0x1d3   : > { %v4764_v38 = vadd.f32 %v1652_v30, %v1384_v11  ;;  %v3012_v30 = vld [vmem:[%s5181_s2 + $0x40] sm:$0xff] }
 0x1d4   : > { %3082 = vperm.xlu2 %3777, %v3012_v30  }
 0x1d6   : > { %v1074_v61 = vpop.f32.mrf.mxu2 }
 0x1d7   : > { %v1157_v53 = vadd.f32 %v1074_v61, %v853_v12  ;;  %v4769_v8 = vpop.f32.mrf.mxu3  ;;  %v2351_v12 = vrot.slane %v4318_v2, 3 }
 0x1d8   : > { %v773_v45 = vpop.f32.mrf.mxu1 }
 0x1d9   : > { %v1385_v47 = vadd.f32 %v4710_v15, %v1157_v53  ;;  %v1657_v46 = vpop.f32.mrf.mxu0  ;;  %v5251_v15 = vld [vmem:[#allocation11_spill] sm:$0xff] }
 0x1da   : > { %v854_v11 = vadd.f32 %v773_v45, %v5251_v15  ;;  %v3786_v53 = vld [vmem:[%s3951_s9 + $0x48] sm:$0xff] }
 0x1db   : > { %3629 = vmatmul.msk.bf16.gmra.mxu1 %vm302_vm1, %v1795_v33  ;;  %3648 = vmatmul.msk.bf16.gmra.mxu2 %vm302_vm1, %v1797_v32  ;;  %v4779_v54 = vadd.f32 %v1654_v41, %v1385_v47  ;;  %v3016_v33 = vld [vmem:[%s5181_s2 + $0x60] sm:$0xff]  ;;  %v2350_v41 = vrot.slane %v4321_v58, 2  ;;  %v1798_v45 = vrot.slane %v3786_v53, 2  ;;  %v2680_v30 = vrot.slane %v3786_v53, 3 }
 0x1dc   : > { %3686 = vmatmul.msk.bf16.gmra.mxu0 %vm302_vm1, %v2679_v24  ;;  %3669 = vmatmul.msk.bf16.gmra.mxu3 %vm302_vm1, %v2349_v44  ;;  %v5252_v47 = vld [vmem:[#allocation13_spill] sm:$0xff] }
 0x1dd   : > { %3102 = vperm.xlu0 %3775, %v3016_v33   ;;  %v2352_v15 = vor.u32 %v2351_v12, %v2350_v41  ;;  %v2681_v2 = vsel %vm2666_vm7, %v2678_v23, %v2680_v30 }
 0x1de   : > { %v1077_v14 = vpop.f32.mrf.mxu2 }
 0x1df   : > { %v1158_v13 = vadd.f32 %v1077_v14, %v854_v11  ;;  %v4784_v43 = vpop.f32.mrf.mxu3  ;;  %v1799_v14 = vsel %vm1782_vm6, %v1796_v18, %v1798_v45 }
 0x1e0   : > { %v775_v25 = vpop.f32.mrf.mxu1 }
 0x1e1   : > { %v1386_v34 = vadd.f32 %v4728_v0, %v1158_v13  ;;  %v1659_v20 = vpop.f32.mrf.mxu0  ;;  %v855_v24 = vadd.f32 %v775_v25, %v5252_v47  ;;  %v2353_v25 = vsel %vm2314_vm5, %v2348_v59, %v2352_v15 }
 0x1e3   : > { %v4792_v61 = vadd.f32 %v1657_v46, %v1386_v34  ;;  %v3017_v46 = vld [vmem:[%s5181_s2 + $0x68] sm:$0xff] }
 0x1e4   : > { %3107 = vperm.xlu1 %3776, %v3017_v46  }
 0x1e6   : > { %v1079_v44 = vpop.f32.mrf.mxu2 }
 0x1e7   : > { %v1159_v0 = vadd.f32 %v1079_v44, %v855_v24  ;;  %v4797_v13 = vpop.f32.mrf.mxu3  ;;  %v2355_v24 = vrot.slane %v4350_v40, 3 }
 0x1e8   : > { %v778_v11 = vpop.f32.mrf.mxu1 }
 0x1e9   : > { %v1387_v33 = vadd.f32 %v4741_v17, %v1159_v0  ;;  %v1662_v58 = vpop.f32.mrf.mxu0  ;;  %v5253_v17 = vld [vmem:[#allocation17_spill] sm:$0xff]  ;;  %v3787_v0 = vld [vmem:[%s3951_s9 + $0x50] sm:$0xff] }
 0x1ea   : > { %v856_v34 = vadd.f32 %v778_v11, %v5253_v17  ;;  %v1800_v11 = vrot.slane %v3787_v0, 2  ;;  %v2682_v46 = vrot.slane %v3787_v0, 3 }
 0x1eb   : > { %3630 = vmatmul.msk.bf16.gmra.mxu1 %vm302_vm1, %v1797_v32  ;;  %3649 = vmatmul.msk.bf16.gmra.mxu2 %vm302_vm1, %v1799_v14  ;;  %v4807_v18 = vadd.f32 %v1659_v20, %v1387_v33  ;;  %v3015_v32 = vld [vmem:[%s5181_s2 + $0x58] sm:$0xff]  ;;  %v2354_v20 = vrot.slane %v4353_v51, 2  ;;  %v5254_v33 = vld [vmem:[#allocation19_spill] sm:$0xff] }
 0x1ec   : > { %3687 = vmatmul.msk.bf16.gmra.mxu0 %vm302_vm1, %v2681_v2  ;;  %3670 = vmatmul.msk.bf16.gmra.mxu3 %vm302_vm1, %v2353_v25  ;;  %v2683_v40 = vsel %vm2666_vm7, %v2680_v30, %v2682_v46 }
 0x1ed   : > { %3097 = vperm.xlu2 %3777, %v3015_v32   ;;  %v2356_v17 = vor.u32 %v2355_v24, %v2354_v20 }
 0x1ee   : > { %v1082_v23 = vpop.f32.mrf.mxu2 }
 0x1ef   : > { %v1160_v41 = vadd.f32 %v1082_v23, %v856_v34  ;;  %v4812_v53 = vpop.f32.mrf.mxu3  ;;  %v1801_v23 = vsel %vm1782_vm6, %v1798_v45, %v1800_v11 }
 0x1f0   : > { %v780_v12 = vpop.f32.mrf.mxu1 }
 0x1f1   : > { %v1388_v59 = vadd.f32 %v4756_v62, %v1160_v41  ;;  %v1664_v47 = vpop.f32.mrf.mxu0  ;;  %v857_v2 = vadd.f32 %v780_v12, %v5254_v33  ;;  %v2357_v12 = vsel %vm2314_vm5, %v2352_v15, %v2356_v17 }
 0x1f3   : > { %v4820_v44 = vadd.f32 %v1662_v58, %v1388_v59  ;;  %v3019_v58 = vld [vmem:[%s5181_s2 + $0x78] sm:$0xff] }
 0x1f4   : > { %3117 = vperm.xlu0 %3775, %v3019_v58  }
 0x1f6   : > { %v1084_v25 = vpop.f32.mrf.mxu2 }
 0x1f7   : > { %v1161_v62 = vadd.f32 %v1084_v25, %v857_v2  ;;  %v4825_v41 = vpop.f32.mrf.mxu3  ;;  %v2359_v2 = vrot.slane %v4382_v31, 3 }
 0x1f8   : > { %v783_v34 = vpop.f32.mrf.mxu1 }
 0x1f9   : > { %v1389_v32 = vadd.f32 %v4769_v8, %v1161_v62  ;;  %v1667_v51 = vpop.f32.mrf.mxu0  ;;  %v5255_v8 = vld [vmem:[#allocation23_spill] sm:$0xff]  ;;  %v3788_v62 = vld [vmem:[%s3951_s9 + $0x58] sm:$0xff] }
 0x1fa   : > { %v858_v59 = vadd.f32 %v783_v34, %v5255_v8  ;;  %v1802_v34 = vrot.slane %v3788_v62, 2  ;;  %v2684_v58 = vrot.slane %v3788_v62, 3  ;;  %v5257_v62 = vld [vmem:[#allocation32_spill] sm:$0xff] }
 0x1fb   : > { %3631 = vmatmul.msk.bf16.gmra.mxu1 %vm302_vm1, %v1799_v14  ;;  %3650 = vmatmul.msk.bf16.gmra.mxu2 %vm302_vm1, %v1801_v23  ;;  %v4835_v45 = vadd.f32 %v1664_v47, %v1389_v32  ;;  %v3020_v14 = vld [vmem:[%s5181_s2 + $0x80] sm:$0xff]  ;;  %v2358_v47 = vrot.slane %v4385_v4, 2 }
 0x1fc   : > { %3688 = vmatmul.msk.bf16.gmra.mxu0 %vm302_vm1, %v2683_v40  ;;  %3671 = vmatmul.msk.bf16.gmra.mxu3 %vm302_vm1, %v2357_v12  ;;  %v5256_v32 = vld [vmem:[#allocation25_spill] sm:$0xff] }
 0x1fd   : > { %3122 = vperm.xlu1 %3776, %v3020_v14   ;;  %v2360_v8 = vor.u32 %v2359_v2, %v2358_v47 }
 0x1fe   : > { %v1087_v30 = vpop.f32.mrf.mxu2 }
 0x1ff   : > { %v1162_v20 = vadd.f32 %v1087_v30, %v858_v59  ;;  %v4840_v0 = vpop.f32.mrf.mxu3  ;;  %v1803_v30 = vsel %vm1782_vm6, %v1800_v11, %v1802_v34 }
 0x200   : > { %v785_v24 = vpop.f32.mrf.mxu1 }
 0x201   : > { %v1390_v15 = vadd.f32 %v4784_v43, %v1162_v20  ;;  %v1669_v33 = vpop.f32.mrf.mxu0  ;;  %v859_v40 = vadd.f32 %v785_v24, %v5256_v32  ;;  %v3018_v24 = vld [vmem:[%s5181_s2 + $0x70] sm:$0xff] }
 0x202   : > { %3112 = vperm.xlu2 %3777, %v3018_v24  }
 0x203   : > { %v4848_v25 = vadd.f32 %v1667_v51, %v1390_v15  ;;  %v2685_v51 = vsel %vm2666_vm7, %v2682_v46, %v2684_v58  ;;  %v2361_v15 = vsel %vm2314_vm5, %v2356_v17, %v2360_v8  ;;  %v3043_v46 = vpop.permute.xlu0 %3042 }
 0x206   : > { %v1089_v12 = vpop.f32.mrf.mxu2 }
 0x207   : > { %v1163_v43 = vadd.f32 %v1089_v12, %v859_v40  ;;  %v4853_v20 = vpop.f32.mrf.mxu3  ;;  %v2362_v40 = vrot.slane %v4419_v37, 2  ;;  %v2363_v12 = vrot.slane %v4416_v36, 3 }
 0x208   : > { %v1886_v59 = vpop.f32.mrf.mxu1 }
 0x209   : > { %v1391_v14 = vadd.f32 %v4797_v13, %v1163_v43  ;;  %v2012_v4 = vadd.f32 %v1886_v59, %v4329_v3  ;;  %v2770_v31 = vpop.f32.mrf.mxu0  ;;  %v4878_v59 = vld [vmem:[%s3951_s9 + $0x60] sm:$0xff] }
 0x20b   : > { %3632 = vmatmul.msk.bf16.gmra.mxu1 %vm302_vm1, %v1801_v23  ;;  %3651 = vmatmul.msk.bf16.gmra.mxu2 %vm302_vm1, %v1803_v30  ;;  %v4864_v11 = vadd.f32 %v1669_v33, %v1391_v14  ;;  %v3022_v33 = vld [vmem:[%s5181_s2 + $0x90] sm:$0xff]  ;;  %v1804_v14 = vrot.slane %v4878_v59, 2 }
 0x20c   : > { %3689 = vmatmul.msk.bf16.gmra.mxu0 %vm302_vm1, %v2685_v51  ;;  %3672 = vmatmul.msk.bf16.gmra.mxu3 %vm302_vm1, %v2361_v15  ;;  %v4882_v51 = vor.u32 %v2363_v12, %v2362_v40  ;;  %v3023_v15 = vld [vmem:[%s5181_s2 + $0x98] sm:$0xff] }
 0x20d   : > { %3132 = vperm.xlu0 %3775, %v3022_v33   ;;  %v1805_v37 = vsel %vm1782_vm6, %v1802_v34, %v1804_v14  ;;  %3137 = vperm.xlu1 %3776, %v3023_v15  }
 0x20e   : > { %v2114_v3 = vpop.f32.mrf.mxu2 }
 0x20f   : > { %v2240_v13 = vadd.f32 %v2114_v3, %v2012_v4  ;;  %v4868_v2 = vpop.f32.mrf.mxu3  ;;  %v2686_v4 = vrot.slane %v4878_v59, 3 }
 0x210   : > { %v1888_v47 = vpop.f32.mrf.mxu1 }
 0x211   : > { %v2592_v17 = vadd.f32 %v4812_v53, %v2240_v13  ;;  %v2013_v32 = vadd.f32 %v1888_v47, %v5257_v62  ;;  %v2772_v23 = vpop.f32.mrf.mxu0  ;;  %v3048_v62 = vpop.permute.xlu0 %3047 }
 0x213   : > { %v2896_v43 = vadd.f32 %v2770_v31, %v2592_v17  ;;  %v2687_v17 = vsel %vm2666_vm7, %v2684_v58, %v2686_v4 }
 0x215   : > { %v3220_v33 = vmul.f32 %v3043_v46, %v2896_v43 }
 0x216   : > { %v2116_v53 = vpop.f32.mrf.mxu2 }
 0x217   : > { %v2241_v24 = vadd.f32 %v2116_v53, %v2013_v32  ;;  %v4888_v13 = vpop.f32.mrf.mxu3  ;;  %v2365_v32 = vsel %vm2314_vm5, %v2360_v8, %v4882_v51  ;;  %v3298_v40 = vmul.f32 %v3220_v33, %v3220_v33 }
 0x218   : > { %v1891_v3 = vpop.f32.mrf.mxu1 }
 0x219   : > { %v2593_v36 = vadd.f32 %v4825_v41, %v2241_v24  ;;  %v2014_v31 = vadd.f32 %v1891_v3, %v4361_v60  ;;  %v2775_v47 = vpop.f32.mrf.mxu0  ;;  %v3025_v60 = vld [vmem:[%s5181_s2 + $0xa8] sm:$0xff] }
 0x21a   : > { %3147 = vperm.xlu0 %3775, %v3025_v60  }
 0x21b   : > { %3633 = vmatmul.msk.bf16.gmra.mxu1 %vm302_vm1, %v1803_v30  ;;  %3652 = vmatmul.msk.bf16.gmra.mxu2 %vm302_vm1, %v1805_v37  ;;  %v2897_v34 = vadd.f32 %v2772_v23, %v2593_v36  ;;  %v3053_v30 = vpop.permute.xlu1 %3052  ;;  %v3026_v23 = vld [vmem:[%s5181_s2 + $0xb0] sm:$0xff] }
 0x21c   : > { %3690 = vmatmul.msk.bf16.gmra.mxu0 %vm302_vm1, %v2687_v17  ;;  %3673 = vmatmul.msk.bf16.gmra.mxu3 %vm302_vm1, %v2365_v32  ;;  %v3021_v17 = vld [vmem:[%s5181_s2 + $0x88] sm:$0xff] }
 0x21d   : > { %v3221_v41 = vmul.f32 %v3048_v62, %v2897_v34  ;;  %3152 = vperm.xlu1 %3776, %v3026_v23   ;;  %3127 = vperm.xlu2 %3777, %v3021_v17   ;;  %v2367_v62 = vrot.slane %v4450_v5, 3  ;;  %v3029_v5 = vld [vmem:[%s5181_s2 + $0xc8] sm:$0xff] }
 0x21e   : > { %v2119_v58 = vpop.f32.mrf.mxu2 }
 0x21f   : > { %v3256_v12 = vadd.f32 %v3221_v41, %v3220_v33  ;;  %v3299_v8 = vmul.f32 %v3221_v41, %v3221_v41  ;;  %v2242_v46 = vadd.f32 %v2119_v58, %v2014_v31  ;;  %v4907_v53 = vpop.f32.mrf.mxu3  ;;  %v2366_v31 = vrot.slane %v4453_v26, 2  ;;  %v4917_v33 = vld [vmem:[%s3951_s9 + $0x68] sm:$0xff] }
 0x220   : > { %v1893_v43 = vpop.f32.mrf.mxu1  ;;  %v1806_v34 = vrot.slane %v4917_v33, 2 }
 0x221   : > { %v3334_v24 = vadd.f32 %v3299_v8, %v3298_v40  ;;  %v2594_v15 = vadd.f32 %v4840_v0, %v2242_v46  ;;  %v2015_v3 = vadd.f32 %v1893_v43, %v4377_v16  ;;  %v2777_v36 = vpop.f32.mrf.mxu0  ;;  %v2688_v0 = vrot.slane %v4917_v33, 3  ;;  %v3028_v16 = vld [vmem:[%s5181_s2 + $0xc0] sm:$0xff]  ;;  %v3037_v33 = vld [vmem:[%s5181_s2 + $0x108] sm:$0xff] }
 0x222   : > { %v4924_v58 = vor.u32 %v2367_v62, %v2366_v31  ;;  %3162 = vperm.xlu0 %3775, %v3028_v16   ;;  %v1807_v46 = vsel %vm1782_vm6, %v1804_v14, %v1806_v34  ;;  %v3063_v62 = vpop.permute.xlu2 %3062 }
 0x223   : > { %v2898_v32 = vadd.f32 %v2775_v47, %v2594_v15 }
 0x224   : > { %v2369_v14 = vsel %vm2314_vm5, %v4882_v51, %v4924_v58 }
 0x225   : > { %v3222_v41 = vmul.f32 %v3053_v30, %v2898_v32  ;;  %3167 = vperm.xlu1 %3776, %v3029_v5   ;;  %v2370_v5 = vrot.slane %v4490_v56, 2 }
 0x226   : > { %v2121_v60 = vpop.f32.mrf.mxu2 }
 0x227   : > { %v3257_v40 = vadd.f32 %v3256_v12, %v3222_v41  ;;  %v3300_v26 = vmul.f32 %v3222_v41, %v3222_v41  ;;  %v2243_v8 = vadd.f32 %v2121_v60, %v2015_v3  ;;  %v4930_v30 = vpop.f32.mrf.mxu3  ;;  %v2689_v12 = vsel %vm2666_vm7, %v2686_v4, %v2688_v0  ;;  %v3058_v3 = vpop.permute.xlu1 %3057  ;;  %v5258_v60 = vld [vmem:[#allocation33_spill] sm:$0xff] }
 0x228   : > { %v1896_v47 = vpop.f32.mrf.mxu1 }
 0x229   : > { %v3335_v23 = vadd.f32 %v3334_v24, %v3300_v26  ;;  %v2595_v43 = vadd.f32 %v4853_v20, %v2243_v8  ;;  %v2016_v15 = vadd.f32 %v1896_v47, %v4394_v57  ;;  %v2780_v17 = vpop.f32.mrf.mxu0  ;;  %v3031_v20 = vld [vmem:[%s5181_s2 + $0xd8] sm:$0xff]  ;;  %v2371_v47 = vrot.slane %v4487_v48, 3 }
 0x22a   : > { %3177 = vperm.xlu0 %3775, %v3031_v20   ;;  %v3035_v48 = vld [vmem:[%s5181_s2 + $0xf8] sm:$0xff] }
 0x22b   : > { %3634 = vmatmul.msk.bf16.gmra.mxu1 %vm302_vm1, %v1805_v37  ;;  %3653 = vmatmul.msk.bf16.gmra.mxu2 %vm302_vm1, %v1807_v46  ;;  %v2899_v24 = vadd.f32 %v2777_v36, %v2595_v43  ;;  %v3032_v37 = vld [vmem:[%s5181_s2 + $0xe0] sm:$0xff] }
 0x22c   : > { %3691 = vmatmul.msk.bf16.gmra.mxu0 %vm302_vm1, %v2689_v12  ;;  %3674 = vmatmul.msk.bf16.gmra.mxu3 %vm302_vm1, %v2369_v14 }
 0x22d   : > { %v3223_v57 = vmul.f32 %v3058_v3, %v2899_v24  ;;  %3182 = vperm.xlu1 %3776, %v3032_v37   ;;  %v3034_v3 = vld [vmem:[%s5181_s2 + $0xf0] sm:$0xff]  ;;  %v4969_v24 = vor.u32 %v2371_v47, %v2370_v5 }
 0x22e   : > { %v2124_v59 = vpop.f32.mrf.mxu2 }
 0x22f   : > { %v3258_v4 = vadd.f32 %v3257_v40, %v3223_v57  ;;  %v3301_v31 = vmul.f32 %v3223_v57, %v3223_v57  ;;  %v2244_v51 = vadd.f32 %v2124_v59, %v2016_v15  ;;  %v4952_v32 = vpop.f32.mrf.mxu3  ;;  %v3024_v40 = vld [vmem:[%s5181_s2 + $0xa0] sm:$0xff]  ;;  %v4962_v15 = vld [vmem:[%s3951_s9 + $0x70] sm:$0xff] }
 0x230   : > { %v1898_v36 = vpop.f32.mrf.mxu1  ;;  %3142 = vperm.xlu2 %3777, %v3024_v40   ;;  %v1808_v12 = vrot.slane %v4962_v15, 2 }
 0x231   : > { %v3336_v41 = vadd.f32 %v3335_v23, %v3301_v31  ;;  %v2596_v16 = vadd.f32 %v4868_v2, %v2244_v51  ;;  %v2017_v26 = vadd.f32 %v1898_v36, %v5258_v60  ;;  %v2782_v8 = vpop.f32.mrf.mxu0  ;;  %v2690_v2 = vrot.slane %v4962_v15, 3 }
 0x232   : > { %3192 = vperm.xlu0 %3775, %v3034_v3   ;;  %v1809_v59 = vsel %vm1782_vm6, %v1806_v34, %v1808_v12  ;;  %v3068_v34 = vpop.permute.xlu2 %3067 }
 0x233   : > { %v2900_v43 = vadd.f32 %v2780_v17, %v2596_v16  ;;  %v3027_v16 = vld [vmem:[%s5181_s2 + $0xb8] sm:$0xff] }
 0x235   : > { %v3224_v23 = vmul.f32 %v3063_v62, %v2900_v43  ;;  %3197 = vperm.xlu1 %3776, %v3035_v48   ;;  %v5259_v43 = vld [vmem:[#allocation34_spill] sm:$0xff] }
 0x236   : > { %v2126_v14 = vpop.f32.mrf.mxu2 }
 0x237   : > { %v3259_v57 = vadd.f32 %v3258_v4, %v3224_v23  ;;  %v3302_v56 = vmul.f32 %v3224_v23, %v3224_v23  ;;  %v2245_v20 = vadd.f32 %v2126_v14, %v2017_v26  ;;  %v4975_v31 = vpop.f32.mrf.mxu3  ;;  %v2691_v4 = vsel %vm2666_vm7, %v2688_v0, %v2690_v2  ;;  %v3030_v14 = vld [vmem:[%s5181_s2 + $0xd0] sm:$0xff] }
 0x238   : > { %v1901_v17 = vpop.f32.mrf.mxu1  ;;  %3157 = vperm.xlu2 %3777, %v3027_v16  }
 0x239   : > { %v3337_v51 = vadd.f32 %v3336_v41, %v3302_v56  ;;  %v2597_v62 = vadd.f32 %v4888_v13, %v2245_v20  ;;  %v2018_v37 = vadd.f32 %v1901_v17, %v4428_v10  ;;  %v2785_v36 = vpop.f32.mrf.mxu0  ;;  %v2373_v41 = vsel %vm2314_vm5, %v4924_v58, %v4969_v24  ;;  %v3792_v17 = vld [vmem:[%s3951_s9 + $0x78] sm:$0xff] }
 0x23a   : > { %3207 = vperm.xlu0 %3775, %v3037_v33   ;;  %v2374_v56 = vrot.slane %v4526_v55, 2  ;;  %v2375_v20 = vrot.slane %v4523_v29, 3 }
 0x23b   : > { %3635 = vmatmul.msk.bf16.gmra.mxu1 %vm302_vm1, %v1807_v46  ;;  %3654 = vmatmul.msk.bf16.gmra.mxu2 %vm302_vm1, %v1809_v59  ;;  %v2901_v10 = vadd.f32 %v2782_v8, %v2597_v62  ;;  %v3038_v46 = vld [vmem:[%s5181_s2 + $0x110] sm:$0xff]  ;;  %v1810_v62 = vrot.slane %v3792_v17, 2 }
 0x23c   : > { %3692 = vmatmul.msk.bf16.gmra.mxu0 %vm302_vm1, %v2691_v4  ;;  %3675 = vmatmul.msk.bf16.gmra.mxu3 %vm302_vm1, %v2373_v41 }
 0x23d   : > { %v3225_v13 = vmul.f32 %v3068_v34, %v2901_v10  ;;  %3212 = vperm.xlu1 %3776, %v3038_v46   ;;  %v3078_v46 = vpop.permute.xlu1 %3077 }
 0x23e   : > { %v2129_v0 = vpop.f32.mrf.mxu2 }
 0x23f   : > { %v3260_v60 = vadd.f32 %v3259_v57, %v3225_v13  ;;  %v3303_v26 = vmul.f32 %v3225_v13, %v3225_v13  ;;  %v2246_v58 = vadd.f32 %v2129_v0, %v2018_v37  ;;  %v5000_v40 = vpop.f32.mrf.mxu3  ;;  %v3073_v57 = vpop.permute.xlu0 %3072  ;;  %v1811_v13 = vsel %vm1782_vm6, %v1808_v12, %v1810_v62 }
 0x240   : > { %v1903_v8 = vpop.f32.mrf.mxu1  ;;  %3172 = vperm.xlu2 %3777, %v3030_v14  }
 0x241   : > { %v3338_v5 = vadd.f32 %v3337_v51, %v3303_v26  ;;  %v2598_v47 = vadd.f32 %v4907_v53, %v2246_v58  ;;  %v2019_v23 = vadd.f32 %v1903_v8, %v5259_v43  ;;  %v2787_v3 = vpop.f32.mrf.mxu0  ;;  %v2692_v51 = vrot.slane %v3792_v17, 3  ;;  %v5260_v26 = vld [vmem:[#allocation35_spill] sm:$0xff] }
 0x242   : > { %v2376_v53 = vor.u32 %v2375_v20, %v2374_v56  ;;  %v3083_v20 = vpop.permute.xlu2 %3082 }
 0x243   : > { %v2902_v48 = vadd.f32 %v2785_v36, %v2598_v47  ;;  %v2693_v58 = vsel %vm2666_vm7, %v2690_v2, %v2692_v51 }
 0x244   : > { %v2377_v12 = vsel %vm2314_vm5, %v4969_v24, %v2376_v53 }
 0x245   : > { %v3226_v37 = vmul.f32 %v3073_v57, %v2902_v48  ;;  %v5262_v48 = vshrl.u32 %v4500_v9, 16 }
 0x246   : > { %v2131_v4 = vpop.f32.mrf.mxu2 }
 0x247   : > { %v3261_v16 = vadd.f32 %v3260_v60, %v3226_v37  ;;  %v3304_v34 = vmul.f32 %v3226_v37, %v3226_v37  ;;  %v2247_v41 = vadd.f32 %v2131_v4, %v2019_v23  ;;  %v5011_v33 = vpop.f32.mrf.mxu3  ;;  %v3033_v60 = vld [vmem:[%s5181_s2 + $0xe8] sm:$0xff]  ;;  %v2378_v17 = vrot.slane %v5262_v48, 2 }
 0x248   : > { %v1906_v10 = vpop.f32.mrf.mxu1  ;;  %3187 = vperm.xlu2 %3777, %v3033_v60   ;;  %v5263_v37 = vshll.u32 %v4500_v9, 16 }
 0x249   : > { %v3339_v0 = vadd.f32 %v3338_v5, %v3304_v34  ;;  %v2599_v55 = vadd.f32 %v4930_v30, %v2247_v41  ;;  %v2020_v29 = vadd.f32 %v1906_v10, %v5260_v26  ;;  %v2790_v36 = vpop.f32.mrf.mxu0  ;;  %v3793_v34 = vld [vmem:[%s3951_s9 + $0x80] sm:$0xff] }
 0x24a   : > { %v2379_v4 = vrot.slane %v5263_v37, 3  ;;  %v1812_v41 = vrot.slane %v3793_v34, 2 }
 0x24b   : > { %3636 = vmatmul.msk.bf16.gmra.mxu1 %vm302_vm1, %v1809_v59  ;;  %3655 = vmatmul.msk.bf16.gmra.mxu2 %vm302_vm1, %v1811_v13  ;;  %v2903_v30 = vadd.f32 %v2787_v3, %v2599_v55  ;;  %v5261_v59 = vld [vmem:[#allocation36_spill] sm:$0xff]  ;;  %v3036_v3 = vld [vmem:[%s5181_s2 + $0x100] sm:$0xff] }
 0x24c   : > { %3693 = vmatmul.msk.bf16.gmra.mxu0 %vm302_vm1, %v2693_v58  ;;  %3676 = vmatmul.msk.bf16.gmra.mxu3 %vm302_vm1, %v2377_v12  ;;  %v2380_v55 = vor.u32 %v2379_v4, %v2378_v17  ;;  %v5265_v17 = vld [vmem:[#allocation38_spill] sm:$0xff] }
 0x24d   : > { %v3227_v8 = vmul.f32 %v3078_v46, %v2903_v30  ;;  %v1813_v46 = vsel %vm1782_vm6, %v1810_v62, %v1812_v41 }
 0x24e   : > { %v2134_v15 = vpop.f32.mrf.mxu2 }
 0x24f   : > { %v3262_v2 = vadd.f32 %v3261_v16, %v3227_v8  ;;  %v3305_v5 = vmul.f32 %v3227_v8, %v3227_v8  ;;  %v2248_v47 = vadd.f32 %v2134_v15, %v2020_v29  ;;  %v5027_v23 = vpop.f32.mrf.mxu3  ;;  %v5264_v8 = vld [vmem:[#allocation37_spill] sm:$0xff] }
 0x250   : > { %v1908_v43 = vpop.f32.mrf.mxu1  ;;  %3202 = vperm.xlu2 %3777, %v3036_v3  }
 0x251   : > { %v3340_v24 = vadd.f32 %v3339_v0, %v3305_v5  ;;  %v2600_v14 = vadd.f32 %v4952_v32, %v2248_v47  ;;  %v2021_v57 = vadd.f32 %v1908_v43, %v5261_v59  ;;  %v2792_v56 = vpop.f32.mrf.mxu0  ;;  %v2694_v32 = vrot.slane %v3793_v34, 3  ;;  %v3088_v47 = vpop.permute.xlu0 %3087 }
 0x252   : > { %v2381_v43 = vsel %vm2314_vm5, %v2376_v53, %v2380_v55 }
 0x253   : > { %v2904_v16 = vadd.f32 %v2790_v36, %v2600_v14  ;;  %v2695_v5 = vsel %vm2666_vm7, %v2692_v51, %v2694_v32  ;;  %v5054_v51 = vld [vmem:[%s3951_s9 + $0x98] sm:$0xff]  }
 0x254   : > { %v2383_v14 = vshrl.u32 %v5054_v51, 16  ;;  %v2386_v59 = vshll.u32 %v5054_v51, 16 }
 0x255   : > { %v3228_v10 = vmul.f32 %v3083_v20, %v2904_v16  ;;  %v3093_v16 = vpop.permute.xlu1 %3092 }
 0x256   : > { %v2136_v0 = vpop.f32.mrf.mxu2  ;;  %v2385_v34 = vrot.slane %v2383_v14, 2  ;;  %v210_v14 = vld [vmem:[%s3951_s9 + $0xa0] sm:$0xf] }
 0x257   : > { %v3263_v26 = vadd.f32 %v3262_v2, %v3228_v10  ;;  %v3306_v29 = vmul.f32 %v3228_v10, %v3228_v10  ;;  %v2249_v58 = vadd.f32 %v2136_v0, %v2021_v57  ;;  %v5040_v12 = vpop.f32.mrf.mxu3  ;;  %v3039_v2 = vld [vmem:[%s5181_s2 + $0x118] sm:$0xff]  ;;  %v2388_v10 = vrot.slane %v2386_v59, 3  ;;  %v3098_v59 = vpop.permute.xlu2 %3097 }
 0x258   : > { %v1911_v60 = vpop.f32.mrf.mxu1  ;;  %3217 = vperm.xlu2 %3777, %v3039_v2  }
 0x259   : > { %v3341_v30 = vadd.f32 %v3340_v24, %v3306_v29  ;;  %v2601_v9 = vadd.f32 %v4975_v31, %v2249_v58  ;;  %v2022_v36 = vadd.f32 %v1911_v60, %v5264_v8  ;;  %v2795_v15 = vpop.f32.mrf.mxu0  ;;  %v3795_v29 = vld [vmem:[%s3951_s9 + $0x88] sm:$0xff]  ;;  %v2389_v8 = vor.u32 %v2388_v10, %v2385_v34  ;;  %v3103_v10 = vpop.permute.xlu0 %3102 }
 0x25a   : > { %v1814_v58 = vrot.slane %v3795_v29, 2 }
 0x25b   : > { %3637 = vmatmul.msk.bf16.gmra.mxu1 %vm302_vm1, %v1811_v13  ;;  %3656 = vmatmul.msk.bf16.gmra.mxu2 %vm302_vm1, %v1813_v46  ;;  %v2905_v62 = vadd.f32 %v2792_v56, %v2601_v9 }
 0x25c   : > { %3694 = vmatmul.msk.bf16.gmra.mxu0 %vm302_vm1, %v2695_v5  ;;  %3677 = vmatmul.msk.bf16.gmra.mxu3 %vm302_vm1, %v2381_v43 }
 0x25d   : > { %v3229_v31 = vmul.f32 %v3088_v47, %v2905_v62 }
 0x25e   : > { %v2139_v24 = vpop.f32.mrf.mxu2 }
 0x25f   : > { %v3264_v53 = vadd.f32 %v3263_v26, %v3229_v31  ;;  %v3307_v57 = vmul.f32 %v3229_v31, %v3229_v31  ;;  %v2250_v3 = vadd.f32 %v2139_v24, %v2022_v36  ;;  %v5058_v20 = vpop.f32.mrf.mxu3  ;;  %v2696_v26 = vrot.slane %v3795_v29, 3 }
 0x260   : > { %v1913_v13 = vpop.f32.mrf.mxu1 }
 0x261   : > { %v3342_v56 = vadd.f32 %v3341_v30, %v3307_v57  ;;  %v2602_v48 = vadd.f32 %v5000_v40, %v2250_v3  ;;  %v2023_v37 = vadd.f32 %v1913_v13, %v5265_v17  ;;  %v2797_v4 = vpop.f32.mrf.mxu0  ;;  %v1815_v40 = vsel %vm1782_vm6, %v1812_v41, %v1814_v58 }
 0x262   : > { %v2697_v24 = vsel %vm2666_vm7, %v2694_v32, %v2696_v26  ;;  %v2390_v57 = vsel %vm2314_vm5, %v2380_v55, %v2389_v8 }
 0x263   : > { %v2906_v0 = vadd.f32 %v2795_v15, %v2602_v48 }
 0x265   : > { %v3230_v60 = vmul.f32 %v3093_v16, %v2906_v0 }
 0x266   : > { %v2141_v9 = vpop.f32.mrf.mxu2 }
 0x267   : > { %v3265_v36 = vadd.f32 %v3264_v53, %v3230_v60  ;;  %v3308_v5 = vmul.f32 %v3230_v60, %v3230_v60  ;;  %v2251_v2 = vadd.f32 %v2141_v9, %v2023_v37  ;;  %v5064_v47 = vpop.f32.mrf.mxu3  ;;  %v2089_v53 = vunpack.c.l.b16 %v210_v14  ;;  %v3796_v9 = vld [vmem:[%s3951_s9 + $0x90] sm:$0xff]   ;;  %s161_s9 = sand.u32 1, %s3851_s13  }
 0x268   : > { %v1916_v30 = vpop.f32.mrf.mxu1  ;;  %s3455_s6 = sshll.u32 %s161_s9, 1  ;;  %s3377_s16 = scalar_lea.sflag [#allocation4], %s161_s9 }
 0x269   : > { %v3343_v43 = vadd.f32 %v3342_v56, %v3308_v5  ;;  %v2603_v62 = vadd.f32 %v5011_v33, %v2251_v2  ;;  %v2024_v15 = vadd.f32 %v1916_v30, %v4537_v21  ;;  %v2800_v31 = vpop.f32.mrf.mxu0  ;;  %v5074_v3 = vpack.c.b16 %v2089_v53, %v2089_v53  ;;  %s163_s17 = scalar_lea.vmem [#allocation3], %s3455_s6 }
 0x26a   : > { %v5084_v5 = vrot.slane %v3796_v9, 2  ;;  %s3389_s19 = sshll.u32 %s163_s17, 4  ;;  %s3390_s19 = int_to_ptr.vmem [resolvable:$true] %s3389_s19 }
 0x26b   : > { %3638 = vmatmul.msk.bf16.gmra.mxu1 %vm302_vm1, %v1813_v46  ;;  %3657 = vmatmul.msk.bf16.gmra.mxu2 %vm302_vm1, %v1815_v40  ;;  %v2907_v41 = vadd.f32 %v2797_v4, %v2603_v62  ;;  %v2392_v32 = vshrl.u32 %v5074_v3, 16  ;;  %v2395_v13 = vshll.u32 %v5074_v3, 16 }
 0x26c   : > { %3695 = vmatmul.msk.bf16.gmra.mxu0 %vm302_vm1, %v2697_v24  ;;  %3678 = vmatmul.msk.bf16.gmra.mxu3 %vm302_vm1, %v2390_v57 }
 0x26d   : > { %v3231_v33 = vmul.f32 %v3098_v59, %v2907_v41  ;;  %v2394_v0 = vrot.slane %v2392_v32, 2  ;;  %v2397_v29 = vrot.slane %v2395_v13, 3 }
 0x26e   : > { %v2144_v21 = vpop.f32.mrf.mxu2 }
 0x26f   : > { %v3266_v55 = vadd.f32 %v3265_v36, %v3231_v33  ;;  %v3309_v56 = vmul.f32 %v3231_v33, %v3231_v33  ;;  %v2252_v48 = vadd.f32 %v2144_v21, %v2024_v15  ;;  %v5079_v17 = vpop.f32.mrf.mxu3  ;;  %v2698_v36 = vrot.slane %v3796_v9, 3  ;;  %v3108_v33 = vpop.permute.xlu1 %3107 }
 0x270   : > { %v1918_v46 = vpop.f32.mrf.mxu1  ;;  %v2398_v62 = vor.u32 %v2397_v29, %v2394_v0 }
 0x271   : > { %v3344_v37 = vadd.f32 %v3343_v43, %v3309_v56  ;;  %v2604_v4 = vadd.f32 %v5027_v23, %v2252_v48  ;;  %v2025_v16 = vadd.f32 %v1918_v46, %v4552_v6  ;;  %v2802_v34 = vpop.f32.mrf.mxu0  ;;  %v1817_v23 = vsel %vm1782_vm6, %v1814_v58, %v5084_v5 }
 0x272   : > { %v2699_v41 = vsel %vm2666_vm7, %v2696_v26, %v2698_v36  ;;  %v2399_v21 = vsel %vm2314_vm5, %v2389_v8, %v2398_v62 }
 0x273   : > { %v2908_v60 = vadd.f32 %v2800_v31, %v2604_v4 }
 0x275   : > { %v3232_v2 = vmul.f32 %v3103_v10, %v2908_v60  ;;  %v2700_v10 = vrot.slane %v5054_v51, 3 }
 0x276   : > { %v2146_v30 = vpop.f32.mrf.mxu2 }
 0x277   : > { %v3267_v15 = vadd.f32 %v3266_v55, %v3232_v2  ;;  %v3310_v24 = vmul.f32 %v3232_v2, %v3232_v2  ;;  %v2253_v14 = vadd.f32 %v2146_v30, %v2025_v16  ;;  %v5088_v6 = vpop.f32.mrf.mxu3  ;;  %v2092_v16 = vrot.slane %v5054_v51, 2 }
 0x278   : > { %v1921_v43 = vpop.f32.mrf.mxu1 }
 0x279   : > { %v3345_v59 = vadd.f32 %v3344_v37, %v3310_v24  ;;  %v2605_v57 = vadd.f32 %v5040_v12, %v2253_v14  ;;  %v2026_v31 = vadd.f32 %v1921_v43, %v4570_v49  ;;  %v2805_v53 = vpop.f32.mrf.mxu0  ;;  %v3113_v37 = vpop.permute.xlu2 %3112  ;;  %v2093_v30 = vsel %vm1782_vm6, %v5084_v5, %v2092_v16 }
 0x27a   : > { %v2701_v14 = vsel %vm2666_vm7, %v2698_v36, %v2700_v10  ;;  %v3118_v43 = vpop.permute.xlu0 %3117 }
 0x27b   : > { %3639 = vmatmul.msk.bf16.gmra.mxu1 %vm302_vm1, %v1815_v40  ;;  %3658 = vmatmul.msk.bf16.gmra.mxu2 %vm302_vm1, %v1817_v23  ;;  %v2909_v32 = vadd.f32 %v2802_v34, %v2605_v57 }
 0x27c   : > { %3696 = vmatmul.msk.bf16.gmra.mxu0 %vm302_vm1, %v2699_v41  ;;  %3679 = vmatmul.msk.bf16.gmra.mxu3 %vm302_vm1, %v2399_v21 }
 0x27d   : > { %v3233_v58 = vmul.f32 %v3108_v33, %v2909_v32  ;;  %v3123_v32 = vpop.permute.xlu1 %3122 }
 0x27e   : > { %v2149_v13 = vpop.f32.mrf.mxu2 }
 0x27f   : > { %v3268_v12 = vadd.f32 %v3267_v15, %v3233_v58  ;;  %v3311_v55 = vmul.f32 %v3233_v58, %v3233_v58  ;;  %v2254_v49 = vadd.f32 %v2149_v13, %v2026_v31  ;;  %v5098_v48 = vpop.f32.mrf.mxu3  ;;  %v1818_v13 = vrot.slane %v4535_v35, 2 }
 0x280   : > { %v1923_v56 = vpop.f32.mrf.mxu1 }
 0x281   : > { %v3346_v26 = vadd.f32 %v3345_v59, %v3311_v55  ;;  %v2606_v8 = vadd.f32 %v5058_v20, %v2254_v49  ;;  %v2027_v40 = vadd.f32 %v1923_v56, %v4585_v22  ;;  %v2807_v46 = vpop.f32.mrf.mxu0  ;;  %v2702_v49 = vrot.slane %v5074_v3, 3 }
 0x283   : > { %v2910_v4 = vadd.f32 %v2805_v53, %v2606_v8 }
 0x285   : > { %v3234_v34 = vmul.f32 %v3113_v37, %v2910_v4 }
 0x286   : > { %v2151_v0 = vpop.f32.mrf.mxu2 }
 0x287   : > { %v3269_v29 = vadd.f32 %v3268_v12, %v3234_v34  ;;  %v3312_v60 = vmul.f32 %v3234_v34, %v3234_v34  ;;  %v2255_v9 = vadd.f32 %v2151_v0, %v2027_v40  ;;  %v5106_v62 = vpop.f32.mrf.mxu3  ;;  %v2094_v12 = vrot.slane %v5074_v3, 2 }
 0x288   : > { %v1926_v2 = vpop.f32.mrf.mxu1  ;;  %v2703_v0 = vsel %vm2666_vm7, %v2700_v10, %v2702_v49 }
 0x289   : > { %v3347_v20 = vadd.f32 %v3346_v26, %v3312_v60  ;;  %v2607_v22 = vadd.f32 %v5064_v47, %v2255_v9  ;;  %v2028_v15 = vadd.f32 %v1926_v2, %v4597_v52  ;;  %v2810_v24 = vpop.f32.mrf.mxu0 }
 0x28b   : > { %3640 = vmatmul.msk.bf16.gmra.mxu1 %vm302_vm1, %v1817_v23  ;;  %3659 = vmatmul.msk.bf16.gmra.mxu2 %vm302_vm1, %v2093_v30  ;;  %v2911_v51 = vadd.f32 %v2807_v46, %v2607_v22 }
 0x28c   : > { %3697 = vmatmul.msk.bf16.gmra.mxu0 %vm302_vm1, %v2701_v14 }
 0x28d   : > { %v3235_v59 = vmul.f32 %v3118_v43, %v2911_v51 }
 0x28e   : > { %v2154_v57 = vpop.f32.mrf.mxu2 }
 0x28f   : > { %v3270_v31 = vadd.f32 %v3269_v29, %v3235_v59  ;;  %v3313_v53 = vmul.f32 %v3235_v59, %v3235_v59  ;;  %v2256_v41 = vadd.f32 %v2154_v57, %v2028_v15  ;;  %v2516_v58 = vpop.f32.mrf.mxu3  ;;  %v3128_v29 = vpop.permute.xlu2 %3127 }
 0x290   : > { %v1928_v33 = vpop.f32.mrf.mxu1  ;;  %v3133_v15 = vpop.permute.xlu0 %3132 }
 0x291   : > { %v3348_v47 = vadd.f32 %v3347_v20, %v3313_v53  ;;  %v2608_v52 = vadd.f32 %v5079_v17, %v2256_v41  ;;  %v2029_v21 = vadd.f32 %v1928_v33, %v4611_v28  ;;  %v2812_v36 = vpop.f32.mrf.mxu0  ;;  %v1819_v17 = vsel %vm1782_vm6, %v5084_v5, %v1818_v13 }
 0x292   : > { %v2095_v28 = vsel %vm1782_vm6, %v2092_v16, %v2094_v12 }
 0x293   : > { %v2912_v23 = vadd.f32 %v2810_v24, %v2608_v52 }
 0x295   : > { %v3236_v55 = vmul.f32 %v3123_v32, %v2912_v23 }
 0x296   : > { %v2156_v56 = vpop.f32.mrf.mxu2 }
 0x297   : > { %v3271_v26 = vadd.f32 %v3270_v31, %v3236_v55  ;;  %v3314_v8 = vmul.f32 %v3236_v55, %v3236_v55  ;;  %v2257_v40 = vadd.f32 %v2156_v56, %v2029_v21  ;;  %v2518_v60 = vpop.f32.mrf.mxu3 }
 0x298   : > { %v1931_v46 = vpop.f32.mrf.mxu1 }
 0x299   : > { %v3349_v37 = vadd.f32 %v3348_v47, %v3314_v8  ;;  %v2609_v4 = vadd.f32 %v5088_v6, %v2257_v40  ;;  %v2030_v35 = vadd.f32 %v1931_v46, %v4624_v1  ;;  %v2815_v34 = vpop.f32.mrf.mxu0  ;;  %v3143_v46 = vpop.permute.xlu2 %3142 }
 0x29b   : > { %3641 = vmatmul.msk.bf16.gmra.mxu1 %vm302_vm1, %v1819_v17  ;;  %3660 = vmatmul.msk.bf16.gmra.mxu2 %vm302_vm1, %v2095_v28  ;;  %v2913_v3 = vadd.f32 %v2812_v36, %v2609_v4 }
 0x29c   : > { %3698 = vmatmul.msk.bf16.gmra.mxu0 %vm302_vm1, %v2703_v0 }
 0x29d   : > { %v3237_v5 = vmul.f32 %v3128_v29, %v2913_v3 }
 0x29e   : > { %v2159_v9 = vpop.f32.mrf.mxu2 }
 0x29f   : > { %v3272_v16 = vadd.f32 %v3271_v26, %v3237_v5  ;;  %v3315_v2 = vmul.f32 %v3237_v5, %v3237_v5  ;;  %v2258_v30 = vadd.f32 %v2159_v9, %v2030_v35  ;;  %v2521_v51 = vpop.f32.mrf.mxu3  ;;  %v3148_v9 = vpop.permute.xlu0 %3147 }
 0x2a0   : > { %v1933_v6 = vpop.f32.mrf.mxu1 }
 0x2a1   : > { %v3350_v20 = vadd.f32 %v3349_v37, %v3315_v2  ;;  %v2610_v1 = vadd.f32 %v5098_v48, %v2258_v30  ;;  %v2031_v10 = vadd.f32 %v1933_v6, %v4642_v7  ;;  %v2817_v22 = vpop.f32.mrf.mxu0  ;;  %v3138_v48 = vpop.permute.xlu1 %3137 }
 0x2a3   : > { %v2914_v24 = vadd.f32 %v2815_v34, %v2610_v1 }
 0x2a5   : > { %v3238_v14 = vmul.f32 %v3133_v15, %v2914_v24 }
 0x2a6   : > { %v2161_v43 = vpop.f32.mrf.mxu2 }
 0x2a7   : > { %v3273_v59 = vadd.f32 %v3272_v16, %v3238_v14  ;;  %v3316_v57 = vmul.f32 %v3238_v14, %v3238_v14  ;;  %v2259_v31 = vadd.f32 %v2161_v43, %v2031_v10  ;;  %v2523_v55 = vpop.f32.mrf.mxu3  ;;  %v5266_v10 = vld [vmem:[#allocation7_spill] sm:$0xff] }
 0x2a8   : > { %v1936_v53 = vpop.f32.mrf.mxu1 }
 0x2a9   : > { %v3351_v41 = vadd.f32 %v3350_v20, %v3316_v57  ;;  %v2611_v33 = vadd.f32 %v5106_v62, %v2259_v31  ;;  %v2032_v47 = vadd.f32 %v1936_v53, %v4655_v19  ;;  %v2820_v52 = vpop.f32.mrf.mxu0  ;;  %v3153_v14 = vpop.permute.xlu1 %3152 }
 0x2ab   : > { %v2915_v21 = vadd.f32 %v2817_v22, %v2611_v33 }
 0x2ad   : > { %v3239_v36 = vmul.f32 %v3138_v48, %v2915_v21  ;;  %v3158_v48 = vpop.permute.xlu2 %3157 }
 0x2ae   : > { %v2164_v7 = vpop.f32.mrf.mxu2 }
 0x2af   : > { %v3274_v32 = vadd.f32 %v3273_v59, %v3239_v36  ;;  %v3317_v23 = vmul.f32 %v3239_v36, %v3239_v36  ;;  %v2260_v13 = vadd.f32 %v2164_v7, %v2032_v47  ;;  %v2526_v3 = vpop.f32.mrf.mxu3 }
 0x2b0   : > { %v1938_v12 = vpop.f32.mrf.mxu1 }
 0x2b1   : > { %v3352_v49 = vadd.f32 %v3351_v41, %v3317_v23  ;;  %v2612_v56 = vadd.f32 %v2516_v58, %v2260_v13  ;;  %v2033_v26 = vadd.f32 %v1938_v12, %v4670_v50  ;;  %v2822_v8 = vpop.f32.mrf.mxu0 }
 0x2b3   : > { %v2916_v40 = vadd.f32 %v2820_v52, %v2612_v56 }
 0x2b5   : > { %v3240_v62 = vmul.f32 %v3143_v46, %v2916_v40  ;;  %v3163_v40 = vpop.permute.xlu0 %3162 }
 0x2b6   : > { %v2166_v17 = vpop.f32.mrf.mxu2 }
 0x2b7   : > { %v3275_v19 = vadd.f32 %v3274_v32, %v3240_v62  ;;  %v3318_v28 = vmul.f32 %v3240_v62, %v3240_v62  ;;  %v2261_v37 = vadd.f32 %v2166_v17, %v2033_v26  ;;  %v5267_v62 = vld [vmem:[#allocation6_spill] sm:$0xff] }
 0x2b8   : > { %v1941_v4 = vpop.f32.mrf.mxu1 }
 0x2b9   : > { %v3353_v35 = vadd.f32 %v3352_v49, %v3318_v28  ;;  %v2613_v34 = vadd.f32 %v2518_v60, %v2261_v37  ;;  %v2034_v0 = vadd.f32 %v1941_v4, %v4680_v63  ;;  %v2825_v29 = vpop.f32.mrf.mxu0  ;;  %v2528_v60 = vpop.f32.mrf.mxu3 }
 0x2bb   : > { %v2917_v5 = vadd.f32 %v2822_v8, %v2613_v34 }
 0x2bd   : > { %v3241_v58 = vmul.f32 %v3148_v9, %v2917_v5  ;;  %v3168_v5 = vpop.permute.xlu1 %3167 }
 0x2be   : > { %v2169_v16 = vpop.f32.mrf.mxu2 }
 0x2bf   : > { %v3276_v50 = vadd.f32 %v3275_v19, %v3241_v58  ;;  %v3319_v2 = vmul.f32 %v3241_v58, %v3241_v58  ;;  %v2262_v30 = vadd.f32 %v2169_v16, %v2034_v0 }
 0x2c0   : > { %v1943_v6 = vpop.f32.mrf.mxu1 }
 0x2c1   : > { %v3354_v20 = vadd.f32 %v3353_v35, %v3319_v2  ;;  %v2614_v1 = vadd.f32 %v2521_v51, %v2262_v30  ;;  %v2035_v22 = vadd.f32 %v1943_v6, %v5266_v10  ;;  %v2827_v15 = vpop.f32.mrf.mxu0  ;;  %v2531_v7 = vpop.f32.mrf.mxu3 }
 0x2c3   : > { %v2918_v24 = vadd.f32 %v2825_v29, %v2614_v1 }
 0x2c5   : > { %v3242_v43 = vmul.f32 %v3153_v14, %v2918_v24 }
 0x2c6   : > { %v2171_v63 = vpop.f32.mrf.mxu2 }
 0x2c7   : > { %v3277_v59 = vadd.f32 %v3276_v50, %v3242_v43  ;;  %v3320_v57 = vmul.f32 %v3242_v43, %v3242_v43  ;;  %v2263_v31 = vadd.f32 %v2171_v63, %v2035_v22 }
 0x2c8   : > { %v1946_v53 = vpop.f32.mrf.mxu1 }
 0x2c9   : > { %v3355_v41 = vadd.f32 %v3354_v20, %v3320_v57  ;;  %v2615_v33 = vadd.f32 %v2523_v55, %v2263_v31  ;;  %v2036_v47 = vadd.f32 %v1946_v53, %v4705_v42  ;;  %v2830_v52 = vpop.f32.mrf.mxu0  ;;  %v2533_v4 = vpop.f32.mrf.mxu3 }
 0x2cb   : > { %v2919_v21 = vadd.f32 %v2827_v15, %v2615_v33  ;;  %v3173_v15 = vpop.permute.xlu2 %3172  ;;  %v3178_v33 = vpop.permute.xlu0 %3177 }
 0x2cd   : > { %v3243_v51 = vmul.f32 %v3158_v48, %v2919_v21 }
 0x2ce   : > { %v2174_v36 = vpop.f32.mrf.mxu2 }
 0x2cf   : > { %v3278_v32 = vadd.f32 %v3277_v59, %v3243_v51  ;;  %v3321_v23 = vmul.f32 %v3243_v51, %v3243_v51  ;;  %v2264_v13 = vadd.f32 %v2174_v36, %v2036_v47 }
 0x2d0   : > { %v1948_v12 = vpop.f32.mrf.mxu1 }
 0x2d1   : > { %v3356_v49 = vadd.f32 %v3355_v41, %v3321_v23  ;;  %v2616_v56 = vadd.f32 %v2526_v3, %v2264_v13  ;;  %v2832_v26 = vpop.f32.mrf.mxu0  ;;  %v2037_v55 = vadd.f32 %v1948_v12, %v5267_v62  ;;  %v2536_v10 = vpop.f32.mrf.mxu3 }
 0x2d3   : > { %v2920_v8 = vadd.f32 %v2830_v52, %v2616_v56 }
 0x2d5   : > { %v3244_v46 = vmul.f32 %v3163_v40, %v2920_v8 }
 0x2d6   : > { %v2176_v17 = vpop.f32.mrf.mxu2 }
 0x2d7   : > { %v3279_v42 = vadd.f32 %v3278_v32, %v3244_v46  ;;  %v3322_v19 = vmul.f32 %v3244_v46, %v3244_v46  ;;  %v2265_v28 = vadd.f32 %v2176_v17, %v2037_v55 }
 0x2d8   : > { %v1951_v37 = vpop.f32.mrf.mxu1 }
 0x2d9   : > { %v3357_v35 = vadd.f32 %v3356_v49, %v3322_v19  ;;  %v2617_v34 = vadd.f32 %v2528_v60, %v2265_v28  ;;  %v2835_v0 = vpop.f32.mrf.mxu0  ;;  %v2038_v3 = vadd.f32 %v1951_v37, %v4736_v39  ;;  %v2538_v47 = vpop.f32.mrf.mxu3 }
 0x2da   : > { %v3183_v49 = vpop.permute.xlu1 %3182  ;;  %v3188_v37 = vpop.permute.xlu2 %3187 }
 0x2db   : > { %v2921_v29 = vadd.f32 %v2832_v26, %v2617_v34 }
 0x2dd   : > { %v3245_v9 = vmul.f32 %v3168_v5, %v2921_v29 }
 0x2de   : > { %v2179_v58 = vpop.f32.mrf.mxu2 }
 0x2df   : > { %v3280_v16 = vadd.f32 %v3279_v42, %v3245_v9  ;;  %v3323_v50 = vmul.f32 %v3245_v9, %v3245_v9  ;;  %v2266_v2 = vadd.f32 %v2179_v58, %v2038_v3 }
 0x2e0   : > { %v1953_v30 = vpop.f32.mrf.mxu1 }
 0x2e1   : > { %v3358_v6 = vadd.f32 %v3357_v35, %v3323_v50  ;;  %v2618_v20 = vadd.f32 %v2531_v7, %v2266_v2  ;;  %v2837_v1 = vpop.f32.mrf.mxu0  ;;  %v2039_v14 = vadd.f32 %v1953_v30, %v4751_v27  ;;  %v2541_v40 = vpop.f32.mrf.mxu3 }
 0x2e2   : > { %v3193_v2 = vpop.permute.xlu0 %3192 }
 0x2e3   : > { %v2922_v22 = vadd.f32 %v2835_v0, %v2618_v20 }
 0x2e5   : > { %v3246_v24 = vmul.f32 %v3173_v15, %v2922_v22 }
 0x2e6   : > { %v2181_v60 = vpop.f32.mrf.mxu2 }
 0x2e7   : > { %v3281_v43 = vadd.f32 %v3280_v16, %v3246_v24  ;;  %v3324_v63 = vmul.f32 %v3246_v24, %v3246_v24  ;;  %v2267_v59 = vadd.f32 %v2181_v60, %v2039_v14 }
 0x2e8   : > { %v1956_v57 = vpop.f32.mrf.mxu1 }
 0x2e9   : > { %v3359_v39 = vadd.f32 %v3358_v6, %v3324_v63  ;;  %v2619_v31 = vadd.f32 %v2533_v4, %v2267_v59  ;;  %v2840_v53 = vpop.f32.mrf.mxu0  ;;  %v2040_v21 = vadd.f32 %v1956_v57, %v4764_v38 }
 0x2eb   : > { %v2923_v41 = vadd.f32 %v2837_v1, %v2619_v31 }
 0x2ed   : > { %v3247_v52 = vmul.f32 %v3178_v33, %v2923_v41 }
 0x2ee   : > { %v2184_v48 = vpop.f32.mrf.mxu2 }
 0x2ef   : > { %v3282_v51 = vadd.f32 %v3281_v43, %v3247_v52  ;;  %v3325_v36 = vmul.f32 %v3247_v52, %v3247_v52  ;;  %v2268_v7 = vadd.f32 %v2184_v48, %v2040_v21  ;;  %v3198_v43 = vpop.permute.xlu1 %3197  ;;  %v3203_v21 = vpop.permute.xlu2 %3202 }
 0x2f0   : > { %v1958_v32 = vpop.f32.mrf.mxu1 }
 0x2f1   : > { %v3360_v27 = vadd.f32 %v3359_v39, %v3325_v36  ;;  %v2620_v23 = vadd.f32 %v2536_v10, %v2268_v7  ;;  %v2842_v13 = vpop.f32.mrf.mxu0  ;;  %v2041_v26 = vadd.f32 %v1958_v32, %v4779_v54  ;;  %v2543_v54 = vpop.f32.mrf.mxu3 }
 0x2f3   : > { %v2924_v12 = vadd.f32 %v2840_v53, %v2620_v23 }
 0x2f5   : > { %v3248_v56 = vmul.f32 %v3183_v49, %v2924_v12 }
 0x2f6   : > { %v2186_v8 = vpop.f32.mrf.mxu2 }
 0x2f7   : > { %v3283_v46 = vadd.f32 %v3282_v51, %v3248_v56  ;;  %v3326_v62 = vmul.f32 %v3248_v56, %v3248_v56  ;;  %v2269_v55 = vadd.f32 %v2186_v8, %v2041_v26  ;;  %v3208_v26 = vpop.permute.xlu0 %3207 }
 0x2f8   : > { %v1961_v17 = vpop.f32.mrf.mxu1 }
 0x2f9   : > { %v3361_v38 = vadd.f32 %v3360_v27, %v3326_v62  ;;  %v2621_v42 = vadd.f32 %v2538_v47, %v2269_v55  ;;  %v2845_v19 = vpop.f32.mrf.mxu0  ;;  %v2042_v35 = vadd.f32 %v1961_v17, %v4792_v61  ;;  %v2546_v14 = vpop.f32.mrf.mxu3 }
 0x2fb   : > { %v2925_v28 = vadd.f32 %v2842_v13, %v2621_v42 }
 0x2fd   : > { %v3249_v4 = vmul.f32 %v3188_v37, %v2925_v28 }
 0x2fe   : > { %v2189_v34 = vpop.f32.mrf.mxu2 }
 0x2ff   : > { %v3284_v0 = vadd.f32 %v3283_v46, %v3249_v4  ;;  %v3327_v29 = vmul.f32 %v3249_v4, %v3249_v4  ;;  %v2270_v5 = vadd.f32 %v2189_v34, %v2042_v35  ;;  %v3213_v4 = vpop.permute.xlu1 %3212 }
 0x300   : > { %v1963_v9 = vpop.f32.mrf.mxu1 }
 0x301   : > { %v3362_v3 = vadd.f32 %v3361_v38, %v3327_v29  ;;  %v2622_v58 = vadd.f32 %v2541_v40, %v2270_v5  ;;  %v2847_v16 = vpop.f32.mrf.mxu0  ;;  %v2043_v6 = vadd.f32 %v1963_v9, %v4807_v18  ;;  %v2548_v48 = vpop.f32.mrf.mxu3 }
 0x303   : > { %v2926_v50 = vadd.f32 %v2845_v19, %v2622_v58 }
 0x305   : > { %v3250_v30 = vmul.f32 %v3193_v2, %v2926_v50  ;;  %v3218_v50 = vpop.permute.xlu2 %3217 }
 0x306   : > { %v2191_v20 = vpop.f32.mrf.mxu2 }
 0x307   : > { %v3285_v1 = vadd.f32 %v3284_v0, %v3250_v30  ;;  %v3328_v10 = vmul.f32 %v3250_v30, %v3250_v30  ;;  %v2271_v22 = vadd.f32 %v2191_v20, %v2043_v6 }
 0x308   : > { %v1966_v15 = vpop.f32.mrf.mxu1 }
 0x309   : > { %v3363_v61 = vadd.f32 %v3362_v3, %v3328_v10  ;;  %v2623_v24 = vadd.f32 %v2543_v54, %v2271_v22  ;;  %v2850_v63 = vpop.f32.mrf.mxu0  ;;  %v2044_v57 = vadd.f32 %v1966_v15, %v4820_v44  ;;  %v2551_v46 = vpop.f32.mrf.mxu3 }
 0x30b   : > { %v2927_v60 = vadd.f32 %v2847_v16, %v2623_v24 }
 0x30d   : > { %v3251_v59 = vmul.f32 %v3198_v43, %v2927_v60 }
 0x30e   : > { %v2194_v39 = vpop.f32.mrf.mxu2 }
 0x30f   : > { %v3286_v31 = vadd.f32 %v3285_v1, %v3251_v59  ;;  %v3329_v53 = vmul.f32 %v3251_v59, %v3251_v59  ;;  %v2272_v41 = vadd.f32 %v2194_v39, %v2044_v57 }
 0x310   : > { %v1968_v33 = vpop.f32.mrf.mxu1 }
 0x311   : > { %v3364_v18 = vadd.f32 %v3363_v61, %v3329_v53  ;;  %v2624_v47 = vadd.f32 %v2546_v14, %v2272_v41  ;;  %v2045_v36 = vadd.f32 %v1968_v33, %v4835_v45  ;;  %v2852_v7 = vpop.f32.mrf.mxu0 }
 0x313   : > { %v2928_v52 = vadd.f32 %v2850_v63, %v2624_v47 }
 0x315   : > { %v3252_v51 = vmul.f32 %v3203_v21, %v2928_v52 }
 0x316   : > { %v2196_v32 = vpop.f32.mrf.mxu2 }
 0x317   : > { %v3287_v27 = vadd.f32 %v3286_v31, %v3252_v51  ;;  %v3330_v23 = vmul.f32 %v3252_v51, %v3252_v51  ;;  %v2273_v13 = vadd.f32 %v2196_v32, %v2045_v36 }
 0x318   : > { %v1971_v12 = vpop.f32.mrf.mxu1 }
 0x319   : > { %v3365_v44 = vadd.f32 %v3364_v18, %v3330_v23  ;;  %v2625_v49 = vadd.f32 %v2548_v48, %v2273_v13  ;;  %v2046_v40 = vadd.f32 %v1971_v12, %v4848_v25  ;;  %v2855_v42 = vpop.f32.mrf.mxu0  ;;  %v2553_v25 = vpop.f32.mrf.mxu3 }
 0x31b   : > { %v2929_v56 = vadd.f32 %v2852_v7, %v2625_v49 }
 0x31d   : > { %v3253_v8 = vmul.f32 %v3208_v26, %v2929_v56 }
 0x31e   : > { %v2199_v62 = vpop.f32.mrf.mxu2 }
 0x31f   : > { %v3288_v55 = vadd.f32 %v3287_v27, %v3253_v8  ;;  %v3331_v17 = vmul.f32 %v3253_v8, %v3253_v8  ;;  %v2274_v38 = vadd.f32 %v2199_v62, %v2046_v40 }
 0x320   : > { %v1973_v28 = vpop.f32.mrf.mxu1 }
 0x321   : > { %v3366_v45 = vadd.f32 %v3365_v44, %v3331_v17  ;;  %v2626_v19 = vadd.f32 %v2551_v46, %v2274_v38  ;;  %v2047_v34 = vadd.f32 %v1973_v28, %v4864_v11  ;;  %v2857_v58 = vpop.f32.mrf.mxu0 }
 0x323   : > { %v2930_v37 = vadd.f32 %v2855_v42, %v2626_v19 }
 0x325   : > { %v3254_v35 = vmul.f32 %v3213_v4, %v2930_v37 }
 0x326   : > { %v2201_v0 = vpop.f32.mrf.mxu2 }
 0x327   : > { %v3289_v29 = vadd.f32 %v3288_v55, %v3254_v35  ;;  %v3332_v5 = vmul.f32 %v3254_v35, %v3254_v35  ;;  %v2275_v9 = vadd.f32 %v2201_v0, %v2047_v34 }
 0x329   : > { %v3367_v54 = vadd.f32 %v3366_v45, %v3332_v5  ;;  %v2627_v3 = vadd.f32 %v2553_v25, %v2275_v9 }
 0x32b   : > { %v2931_v16 = vadd.f32 %v2857_v58, %v2627_v3 }
 0x32d   : > { %v3255_v2 = vmul.f32 %v3218_v50, %v2931_v16 }
 0x32f   : > { %v3290_v30 = vadd.f32 %v3289_v29, %v3255_v2  ;;  %v3333_v6 = vmul.f32 %v3255_v2, %v3255_v2 }
 0x331   : > { %v3291_v20 = vrot.slane %v3290_v30, 4  ;;  %v3368_v1 = vadd.f32 %v3367_v54, %v3333_v6 }
 0x333   : > { %v3292_v10 = vadd.f32 %v3291_v20, %v3290_v30  ;;  %v3369_v11 = vrot.slane %v3368_v1, 4 }
 0x335   : > { %v3293_v22 = vrot.slane %v3292_v10, 2  ;;  %v3370_v15 = vadd.f32 %v3369_v11, %v3368_v1 }
 0x337   : > { %v3294_v61 = vadd.f32 %v3293_v22, %v3292_v10  ;;  %v3371_v24 = vrot.slane %v3370_v15, 2 }
 0x339   : > { %v3295_v14 = vrot.slane %v3294_v61, 1  ;;  %v3372_v60 = vadd.f32 %v3371_v24, %v3370_v15 }
 0x33b   : > { %v3296_v43 = vadd.f32 %v3295_v14, %v3294_v61  ;;  %v3373_v63 = vrot.slane %v3372_v60, 1 }
 0x33d   : > { %3297 = vst [vmem:[%s163_s17] sm:$0x1] %v3296_v43  ;;  %v3374_v59 = vadd.f32 %v3373_v63, %v3372_v60 }
 0x33f   : > { %3375 = vst [vmem:[%s163_s17 + $0x1] sm:$0x1] %v3374_v59 }
 0x340   : > { %3824 = shalt.err (!%p3821_p3)
}
 0x341   : > { %3735 = dma.vmem_to_hbm [thread:$0]  (%p3920_p5), %s3390_s19, 32, %s3392_s20, %s3377_s16  }
 0x342 PF: > { %p3741_p4 = scmp.ge.s32.totalorder %s3859_s15, 2  ;;  %s3403_s4 = sand.u32 1, %s3847_s12  }
 0x343   : > { %s3404_s5 = scalar_lea.sflag [#allocation4], %s3403_s4 }
 0x344   : > { %p3738_p7 = pnand %p3741_p4, %p3924_p6 }
 0x346   : > { %p3739_p8 = pneg %p3738_p7 }
 0x348   : > { %3842 = dma.done.wait (%p3739_p8), %s3404_s5, 32  }
 0x349   : > { %3844 = vsyncadd (%p3739_p8), %s3404_s5, 4294967264  ;;  %p13_p9 = scmp.ge.s32.totalorder %s3907_s18, 4   ;;  %s5268_s12 = smov %s3851_s13 }
 0x34a   : > { %s5269_s13 = smov %s3855_s14  ;;  %s5270_s14 = smov %s3918_s21 }
 0x34b   : > { %s5271_s15 = smov %s3907_s18  ;;  %15 = sbr.rel (!%p13_p9) target bundleno = 3 (0x3), region = 75 }
 0x350   :  { %3410 = vsyncpa [#allocation4], 1 }
 0x351   :  { %3412 = vsyncpa [#allocation4 + $0x1], 1 }

</bundles_post_ra>
